<compile_context>
chip_gen: v7x
topology: tpu7x:2x2x1
jax: 0.10.0
libtpu: 0.0.40
codegen_flags: <defaults>
</compile_context>

<pallas_src>
import functools

import numpy as np
import jax
import jax.numpy as jnp
from jax.experimental import pallas as pl
from jax.experimental.pallas import tpu as pltpu


# ---------------------------------------------------------------------------
# In-kernel building blocks.  Activations are a flattened (seq_tile*batch, D)
# tile; D sits in the lane dimension (lane-dense loads/stores).
# ---------------------------------------------------------------------------

def _layer_norm(y, gamma, beta, eps):
    mu = jnp.mean(y, axis=-1, keepdims=True)
    var = jnp.mean(jnp.square(y - mu), axis=-1, keepdims=True)
    return (y - mu) * jax.lax.rsqrt(var + eps) * gamma + beta


def _mha(q_rows, kv_rows, wq, wk, wv, *, batch, head_num, scale):
    """Multi-head attention with the module's literal torch.matmul semantics:
    the (seq, batch, d) matmuls batch over seq, scores are (seq, batch, batch)."""
    rows, _ = q_rows.shape
    ts = rows // batch
    outs = []
    for h in range(head_num):                       # static unroll over heads
        q = jnp.dot(q_rows, wq[h], preferred_element_type=jnp.float32)
        k = jnp.dot(kv_rows, wk[h], preferred_element_type=jnp.float32)
        v = jnp.dot(kv_rows, wv[h], preferred_element_type=jnp.float32)
        q3 = q.reshape(ts, batch, q.shape[-1])
        k3 = k.reshape(ts, batch, k.shape[-1])
        v3 = v.reshape(ts, batch, v.shape[-1])
        s = jnp.einsum("sbk,sck->sbc", q3, k3,
                       preferred_element_type=jnp.float32) * scale
        s = s - jnp.max(s, axis=-1, keepdims=True)
        p = jnp.exp(s)
        p = p / jnp.sum(p, axis=-1, keepdims=True)
        o = jnp.einsum("sbc,scv->sbv", p, v3, preferred_element_type=jnp.float32)
        outs.append(o.reshape(rows, -1))
    return jnp.concatenate(outs, axis=-1)


def _ffn(y, w1, b1, w2, b2):
    h = jnp.maximum(jnp.dot(y, w1, preferred_element_type=jnp.float32) + b1, 0.0)
    return jnp.dot(h, w2, preferred_element_type=jnp.float32) + b2


# ---------------------------------------------------------------------------
# Fused layer kernels (one pallas_call per encoder / decoder layer).
# ---------------------------------------------------------------------------

def _encoder_layer_kernel(x_ref, wq_ref, wk_ref, wv_ref,
                          ln1g_ref, ln1b_ref,
                          w1_ref, b1_ref, w2_ref, b2_ref,
                          ln2g_ref, ln2b_ref, o_ref,
                          *, batch, head_num, eps, scale):
    f32 = jnp.float32
    x = x_ref[...].astype(f32)
    attn = _mha(x, x,
                wq_ref[...].astype(f32), wk_ref[...].astype(f32),
                wv_ref[...].astype(f32),
                batch=batch, head_num=head_num, scale=scale)
    # TODO(synk): training-mode dropout not emitted (dropout1/2 are identity in eval).
    y = _layer_norm(x + attn, ln1g_ref[...].astype(f32), ln1b_ref[...].astype(f32), eps)
    ff = _ffn(y, w1_ref[...].astype(f32), b1_ref[...].astype(f32),
              w2_ref[...].astype(f32), b2_ref[...].astype(f32))
    o_ref[...] = _layer_norm(y + ff, ln2g_ref[...].astype(f32),
                             ln2b_ref[...].astype(f32), eps).astype(o_ref.dtype)


def _decoder_layer_kernel(t_ref, m_ref,
                          wq1_ref, wk1_ref, wv1_ref, ln1g_ref, ln1b_ref,
                          wq2_ref, wk2_ref, wv2_ref, ln2g_ref, ln2b_ref,
                          w1_ref, b1_ref, w2_ref, b2_ref, ln3g_ref, ln3b_ref,
                          o_ref, *, batch, head_num, eps, scale):
    f32 = jnp.float32
    t = t_ref[...].astype(f32)
    m = m_ref[...].astype(f32)
    a1 = _mha(t, t,
              wq1_ref[...].astype(f32), wk1_ref[...].astype(f32),
              wv1_ref[...].astype(f32),
              batch=batch, head_num=head_num, scale=scale)
    y = _layer_norm(t + a1, ln1g_ref[...].astype(f32), ln1b_ref[...].astype(f32), eps)
    a2 = _mha(y, m,
              wq2_ref[...].astype(f32), wk2_ref[...].astype(f32),
              wv2_ref[...].astype(f32),
              batch=batch, head_num=head_num, scale=scale)
    y = _layer_norm(y + a2, ln2g_ref[...].astype(f32), ln2b_ref[...].astype(f32), eps)
    ff = _ffn(y, w1_ref[...].astype(f32), b1_ref[...].astype(f32),
              w2_ref[...].astype(f32), b2_ref[...].astype(f32))
    # TODO(synk): training-mode dropout and target/memory masks not emitted.
    o_ref[...] = _layer_norm(y + ff, ln3g_ref[...].astype(f32),
                             ln3b_ref[...].astype(f32), eps).astype(o_ref.dtype)


# ---------------------------------------------------------------------------
# Wrappers: grid over seq_len, lane-dense (seq*batch, dim_model) activations.
# ---------------------------------------------------------------------------

def _choose_seq_tile(seq_len, batch, dim_model, dim_ff, head_num, dim_key,
                     itemsize=4, budget_bytes=8 * 1024 * 1024):
    """Largest seq tile (dividing seq_len) whose double-buffered activation tiles
    plus resident layer weights fit a conservative VMEM budget -- safe on v5e's
    16 MiB default scoped VMEM and well inside v7x's 64 MiB physical VMEM."""
    dim_v = dim_model // head_num
    weight_bytes = itemsize * (
        4 * head_num * dim_model * dim_key          # wq1, wk1, wq2, wk2
        + 2 * head_num * dim_model * dim_v          # wv1, wv2
        + 2 * dim_model * dim_ff + dim_ff + dim_model   # ffn
        + 6 * dim_model)                            # layer norms
    avail = max(budget_bytes - 2 * weight_bytes, itemsize * 48 * dim_model)
    # target + memory + output tiles, each double-buffered -> ~6x one tile.
    max_rows = max(8, avail // (6 * dim_model * itemsize))
    max_ts = max(1, max_rows // batch)
    best = None
    for cand in range(1, seq_len + 1):
        if seq_len % cand or cand > max_ts:
            continue
        if (cand * batch) % 8 == 0 or cand == seq_len:   # sublane constraint
            best = cand
    return best if best is not None else seq_len


def _full_spec(a):
    return pl.BlockSpec(a.shape, lambda i: (0,) * a.ndim)


def _pallas_layer_call(kernel, row_args, weight_args, *, seq_len, batch,
                       dim_model, seq_tile, dtype):
    rows_per_tile = seq_tile * batch
    grid = (pl.cdiv(seq_len, seq_tile),)
    row_spec = pl.BlockSpec((rows_per_tile, dim_model), lambda i: (i, 0))
    in_specs = [row_spec] * len(row_args) + [_full_spec(w) for w in weight_args]
    return pl.pallas_call(
        kernel,
        out_shape=jax.ShapeDtypeStruct((seq_len * batch, dim_model), dtype),
        grid_spec=pl.GridSpec(grid=grid, in_specs=in_specs, out_specs=row_spec),
        compiler_params=pltpu.CompilerParams(
            # Seq tiles are fully independent -> shard across TCs (v7x megacore).
            dimension_semantics=("parallel",)),
    )(*row_args, *weight_args)


def _encoder_layer(x2, p, *, seq_len, batch, head_num, eps, seq_tile):
    dim_model = x2.shape[-1]
    scale = 1.0 / float(np.sqrt(dim_model))
    kernel = functools.partial(_encoder_layer_kernel, batch=batch,
                               head_num=head_num, eps=eps, scale=scale)
    weights = (p["wq"], p["wk"], p["wv"], p["ln1_g"], p["ln1_b"],
               p["w1"], p["b1"], p["w2"], p["b2"], p["ln2_g"], p["ln2_b"])
    return _pallas_layer_call(kernel, (x2,), weights, seq_len=seq_len, batch=batch,
                              dim_model=dim_model, seq_tile=seq_tile, dtype=x2.dtype)


def _decoder_layer(t2, m2, p, *, seq_len, batch, head_num, eps, seq_tile):
    dim_model = t2.shape[-1]
    scale = 1.0 / float(np.sqrt(dim_model))
    kernel = functools.partial(_decoder_layer_kernel, batch=batch,
                               head_num=head_num, eps=eps, scale=scale)
    weights = (p["wq1"], p["wk1"], p["wv1"], p["ln1_g"], p["ln1_b"],
               p["wq2"], p["wk2"], p["wv2"], p["ln2_g"], p["ln2_b"],
               p["w1"], p["b1"], p["w2"], p["b2"], p["ln3_g"], p["ln3_b"])
    return _pallas_layer_call(kernel, (t2, m2), weights, seq_len=seq_len, batch=batch,
                              dim_model=dim_model, seq_tile=seq_tile, dtype=t2.dtype)


def transformer_forward(x, params, *, head_num, eps=1e-5,
                        num_encoder_layers=6, num_decoder_layers=6,
                        seq_tile=None, memory=None):
    seq_len, batch, dim_model = x.shape
    dim_ff = params["encoder"]["w1"].shape[-1]
    dim_key = params["encoder"]["wq"].shape[-1]
    if seq_tile is None:
        seq_tile = _choose_seq_tile(seq_len, batch, dim_model, dim_ff,
                                    head_num, dim_key)
    assert seq_len % seq_tile == 0
    assert (seq_tile * batch) % 8 == 0 or seq_tile == seq_len, (
        "seq_tile*batch must be a multiple of 8 (sublane) or cover the full seq")

    # Match parameter dtype to the activation dtype once outside the kernels
    # (halves weight DMA bytes if x is bf16); in-kernel math accumulates in f32.
    params = jax.tree_util.tree_map(lambda w: w.astype(x.dtype), params)

    # Lane-dense view: (seq*batch, dim_model) so dim_model sits in the lane axis.
    x2 = x.reshape(seq_len * batch, dim_model)
    for _ in range(num_encoder_layers):          # shared weights (same layer reused)
        x2 = _encoder_layer(x2, params["encoder"], seq_len=seq_len, batch=batch,
                            head_num=head_num, eps=eps, seq_tile=seq_tile)
    mem2 = x2 if memory is None else memory.reshape(seq_len * batch, dim_model)
    for _ in range(num_decoder_layers):          # shared weights (same layer reused)
        x2 = _decoder_layer(x2, mem2, params["decoder"], seq_len=seq_len, batch=batch,
                            head_num=head_num, eps=eps, seq_tile=seq_tile)
    return x2.reshape(seq_len, batch, dim_model)


# ---------------------------------------------------------------------------
# Parameter construction + plain-JAX reference (same math, for verification).
# ---------------------------------------------------------------------------

def init_params(key, dim_model, head_num, dim_key, dim_ff):
    assert dim_model % head_num == 0
    dim_v = dim_model // head_num
    ks = jax.random.split(key, 17)

    def lin(k, fan_in, shape):
        bound = 1.0 / float(np.sqrt(fan_in))
        return jax.random.uniform(k, shape, jnp.float32, -bound, bound)

    ones, zeros = jnp.ones((1, dim_model), jnp.float32), jnp.zeros((1, dim_model), jnp.float32)
    enc = dict(
        wq=lin(ks[0], dim_model, (head_num, dim_model, dim_key)),
        wk=lin(ks[1], dim_model, (head_num, dim_model, dim_key)),
        wv=lin(ks[2], dim_model, (head_num, dim_model, dim_v)),
        ln1_g=ones, ln1_b=zeros,
        w1=lin(ks[3], dim_model, (dim_model, dim_ff)),
        b1=lin(ks[4], dim_model, (1, dim_ff)),
        w2=lin(ks[5], dim_ff, (dim_ff, dim_model)),
        b2=lin(ks[6], dim_ff, (1, dim_model)),
        ln2_g=ones, ln2_b=zeros,
    )
    dec = dict(
        wq1=lin(ks[7], dim_model, (head_num, dim_model, dim_key)),
        wk1=lin(ks[8], dim_model, (head_num, dim_model, dim_key)),
        wv1=lin(ks[9], dim_model, (head_num, dim_model, dim_v)),
        ln1_g=ones, ln1_b=zeros,
        wq2=lin(ks[10], dim_model, (head_num, dim_model, dim_key)),
        wk2=lin(ks[11], dim_model, (head_num, dim_model, dim_key)),
        wv2=lin(ks[12], dim_model, (head_num, dim_model, dim_v)),
        ln2_g=ones, ln2_b=zeros,
        w1=lin(ks[13], dim_model, (dim_model, dim_ff)),
        b1=lin(ks[14], dim_model, (1, dim_ff)),
        w2=lin(ks[15], dim_ff, (dim_ff, dim_model)),
        b2=lin(ks[16], dim_ff, (1, dim_model)),
        ln3_g=ones, ln3_b=zeros,
    )
    return dict(encoder=enc, decoder=dec)


def _mha_ref(q, kv, wq, wk, wv, scale):
    outs = []
    for h in range(wq.shape[0]):
        qh, kh, vh = q @ wq[h], kv @ wk[h], kv @ wv[h]
        s = jnp.einsum("sbk,sck->sbc", qh, kh) * scale
        p = jax.nn.softmax(s, axis=-1)
        outs.append(jnp.einsum("sbc,scv->sbv", p, vh))
    return jnp.concatenate(outs, axis=-1)


def _ln_ref(y, g, b, eps):
    mu = jnp.mean(y, axis=-1, keepdims=True)
    var = jnp.mean(jnp.square(y - mu), axis=-1, keepdims=True)
    return (y - mu) * jax.lax.rsqrt(var + eps) * g + b


def _enc_ref(x, p, eps, scale):
    y = _ln_ref(x + _mha_ref(x, x, p["wq"], p["wk"], p["wv"], scale),
                p["ln1_g"], p["ln1_b"], eps)
    f = jnp.maximum(y @ p["w1"] + p["b1"], 0.0) @ p["w2"] + p["b2"]
    return _ln_ref(y + f, p["ln2_g"], p["ln2_b"], eps)


def _dec_ref(t, m, p, eps, scale):
    y = _ln_ref(t + _mha_ref(t, t, p["wq1"], p["wk1"], p["wv1"], scale),
                p["ln1_g"], p["ln1_b"], eps)
    y = _ln_ref(y + _mha_ref(y, m, p["wq2"], p["wk2"], p["wv2"], scale),
                p["ln2_g"], p["ln2_b"], eps)
    f = jnp.maximum(y @ p["w1"] + p["b1"], 0.0) @ p["w2"] + p["b2"]
    return _ln_ref(y + f, p["ln3_g"], p["ln3_b"], eps)


def transformer_ref(x, params, *, head_num, eps, num_encoder_layers, num_decoder_layers):
    scale = 1.0 / float(np.sqrt(x.shape[-1]))
    for _ in range(num_encoder_layers):
        x = _enc_ref(x, params["encoder"], eps, scale)
    m = x
    for _ in range(num_decoder_layers):
        x = _dec_ref(x, m, params["decoder"], eps, scale)
    return x


if __name__ == "__main__":
    # Small shapes consistent with the module's (seq_len, batch_size, embed_dim) input.
    seq_len, batch, dim_model = 16, 2, 32
    head_num, dim_key, dim_ff = 4, 8, 64
    num_encoder_layers, num_decoder_layers = 2, 2
    layer_norm_eps = 1e-5

    key = jax.random.PRNGKey(0)
    kx, kp = jax.random.split(key)
    x = jax.random.normal(kx, (seq_len, batch, dim_model), dtype=jnp.float32)
    params = init_params(kp, dim_model, head_num, dim_key, dim_ff)

    # seq_tile=4 -> a real 4-step pipelined grid even at this tiny demo size;
    # seq_tile=None picks the largest VMEM-budgeted divisor of seq_len.
    out = transformer_forward(x, params, head_num=head_num, eps=layer_norm_eps,
                              num_encoder_layers=num_encoder_layers,
                              num_decoder_layers=num_decoder_layers,
                              seq_tile=4)
    out = jax.block_until_ready(out)

    ref = transformer_ref(x, params, head_num=head_num, eps=layer_norm_eps,
                          num_encoder_layers=num_encoder_layers,
                          num_decoder_layers=num_decoder_layers)
    np.testing.assert_allclose(np.asarray(out), np.asarray(ref), rtol=5e-2, atol=5e-2)
    print("KERNEL_OK")
</pallas_src>

<mosaic_0001>
module attributes {stable_mosaic.version = 11 : i64} {
  func.func @_encoder_layer_kernel(%arg0: i32, %arg1: memref<8x32xf32, #tpu.memory_space<vmem>>, %arg2: memref<4x32x8xf32, #tpu.memory_space<vmem>>, %arg3: memref<4x32x8xf32, #tpu.memory_space<vmem>>, %arg4: memref<4x32x8xf32, #tpu.memory_space<vmem>>, %arg5: memref<1x32xf32, #tpu.memory_space<vmem>>, %arg6: memref<1x32xf32, #tpu.memory_space<vmem>>, %arg7: memref<32x64xf32, #tpu.memory_space<vmem>>, %arg8: memref<1x64xf32, #tpu.memory_space<vmem>>, %arg9: memref<64x32xf32, #tpu.memory_space<vmem>>, %arg10: memref<1x32xf32, #tpu.memory_space<vmem>>, %arg11: memref<1x32xf32, #tpu.memory_space<vmem>>, %arg12: memref<1x32xf32, #tpu.memory_space<vmem>>, %arg13: memref<8x32xf32, #tpu.memory_space<vmem>>) attributes {dimension_semantics = [#tpu.dimension_semantics<parallel>], iteration_bounds = array<i64: 4>, scalar_prefetch = 0 : i64, scratch_operands = 0 : i64, tpu.core_type = #tpu.core_type<tc>, window_params = [{transform_indices = @transform_0, window_bounds = array<i64: 8, 32>}, {pipeline_mode = #tpu.pipeline_mode<synchronous>, transform_indices = @transform_1, window_bounds = array<i64: 4, 32, 8>}, {pipeline_mode = #tpu.pipeline_mode<synchronous>, transform_indices = @transform_2, window_bounds = array<i64: 4, 32, 8>}, {pipeline_mode = #tpu.pipeline_mode<synchronous>, transform_indices = @transform_3, window_bounds = array<i64: 4, 32, 8>}, {pipeline_mode = #tpu.pipeline_mode<synchronous>, transform_indices = @transform_4, window_bounds = array<i64: 1, 32>}, {pipeline_mode = #tpu.pipeline_mode<synchronous>, transform_indices = @transform_5, window_bounds = array<i64: 1, 32>}, {pipeline_mode = #tpu.pipeline_mode<synchronous>, transform_indices = @transform_6, window_bounds = array<i64: 32, 64>}, {pipeline_mode = #tpu.pipeline_mode<synchronous>, transform_indices = @transform_7, window_bounds = array<i64: 1, 64>}, {pipeline_mode = #tpu.pipeline_mode<synchronous>, transform_indices = @transform_8, window_bounds = array<i64: 64, 32>}, {pipeline_mode = #tpu.pipeline_mode<synchronous>, transform_indices = @transform_9, window_bounds = array<i64: 1, 32>}, {pipeline_mode = #tpu.pipeline_mode<synchronous>, transform_indices = @transform_10, window_bounds = array<i64: 1, 32>}, {pipeline_mode = #tpu.pipeline_mode<synchronous>, transform_indices = @transform_11, window_bounds = array<i64: 1, 32>}, {transform_indices = @transform_12, window_bounds = array<i64: 8, 32>}]} {
    %c0 = arith.constant 0 : index
    %c0_0 = arith.constant 0 : index
    %0 = vector.load %arg1[%c0, %c0_0] : memref<8x32xf32, #tpu.memory_space<vmem>>, vector<8x32xf32>
    %c0_1 = arith.constant 0 : index
    %c0_2 = arith.constant 0 : index
    %c0_3 = arith.constant 0 : index
    %1 = vector.load %arg2[%c0_1, %c0_2, %c0_3] : memref<4x32x8xf32, #tpu.memory_space<vmem>>, vector<4x32x8xf32>
    %c0_4 = arith.constant 0 : index
    %c0_5 = arith.constant 0 : index
    %c0_6 = arith.constant 0 : index
    %2 = vector.load %arg3[%c0_4, %c0_5, %c0_6] : memref<4x32x8xf32, #tpu.memory_space<vmem>>, vector<4x32x8xf32>
    %c0_7 = arith.constant 0 : index
    %c0_8 = arith.constant 0 : index
    %c0_9 = arith.constant 0 : index
    %3 = vector.load %arg4[%c0_7, %c0_8, %c0_9] : memref<4x32x8xf32, #tpu.memory_space<vmem>>, vector<4x32x8xf32>
    %4 = vector.extract_strided_slice %1 {offsets = [0, 0, 0], sizes = [1, 32, 8], strides = [1, 1, 1]} : vector<4x32x8xf32> to vector<1x32x8xf32>
    %5 = vector.shape_cast %4 : vector<1x32x8xf32> to vector<32x8xf32>
    %cst = arith.constant dense<0.000000e+00> : vector<8x8xf32>
    %6 = tpu.matmul %0, %5, %cst {dimension_numbers = #tpu.dot_dimension_numbers<[1], [0], [0], [1], [0, 0, 1, 1], [], []>} : vector<8x32xf32>, vector<32x8xf32>, vector<8x8xf32> -> vector<8x8xf32>
    %7 = vector.extract_strided_slice %2 {offsets = [0, 0, 0], sizes = [1, 32, 8], strides = [1, 1, 1]} : vector<4x32x8xf32> to vector<1x32x8xf32>
    %8 = vector.shape_cast %7 : vector<1x32x8xf32> to vector<32x8xf32>
    %cst_10 = arith.constant dense<0.000000e+00> : vector<8x8xf32>
    %9 = tpu.matmul %0, %8, %cst_10 {dimension_numbers = #tpu.dot_dimension_numbers<[1], [0], [0], [1], [0, 0, 1, 1], [], []>} : vector<8x32xf32>, vector<32x8xf32>, vector<8x8xf32> -> vector<8x8xf32>
    %10 = vector.extract_strided_slice %3 {offsets = [0, 0, 0], sizes = [1, 32, 8], strides = [1, 1, 1]} : vector<4x32x8xf32> to vector<1x32x8xf32>
    %11 = vector.shape_cast %10 : vector<1x32x8xf32> to vector<32x8xf32>
    %cst_11 = arith.constant dense<0.000000e+00> : vector<8x8xf32>
    %12 = tpu.matmul %0, %11, %cst_11 {dimension_numbers = #tpu.dot_dimension_numbers<[1], [0], [0], [1], [0, 0, 1, 1], [], []>} : vector<8x32xf32>, vector<32x8xf32>, vector<8x8xf32> -> vector<8x8xf32>
    %13 = vector.shape_cast %6 : vector<8x8xf32> to vector<4x2x8xf32>
    %14 = vector.shape_cast %9 : vector<8x8xf32> to vector<4x2x8xf32>
    %15 = vector.shape_cast %12 : vector<8x8xf32> to vector<4x2x8xf32>
    "tpu.trace_start"() <{level = 10 : i32, message = "sbk,sck->sbc"}> : () -> ()
    %cst_12 = arith.constant dense<0.000000e+00> : vector<4x2x2xf32>
    %16 = tpu.matmul %13, %14, %cst_12 {dimension_numbers = #tpu.dot_dimension_numbers<[2], [2], [1], [1], [0, 0, 0, 1, 1, 1], [0], [0]>} : vector<4x2x8xf32>, vector<4x2x8xf32>, vector<4x2x2xf32> -> vector<4x2x2xf32>
    "tpu.trace_stop"() : () -> ()
    %cst_13 = arith.constant 0.176776692 : f32
    %17 = vector.broadcast %cst_13 : f32 to vector<4x2x2xf32>
    %18 = arith.mulf %16, %17 : vector<4x2x2xf32>
    %cst_14 = arith.constant dense<0xFF800000> : vector<4x2xf32>
    %19 = vector.multi_reduction <maximumf>, %18, %cst_14 [2] : vector<4x2x2xf32> to vector<4x2xf32>
    %20 = vector.shape_cast %19 : vector<4x2xf32> to vector<4x2x1xf32>
    %21 = vector.broadcast %20 : vector<4x2x1xf32> to vector<4x2x2xf32>
    %22 = arith.subf %18, %21 : vector<4x2x2xf32>
    %23 = math.exp %22 : vector<4x2x2xf32>
    %cst_15 = arith.constant dense<0.000000e+00> : vector<4x2xf32>
    %24 = vector.multi_reduction <add>, %23, %cst_15 [2] : vector<4x2x2xf32> to vector<4x2xf32>
    %25 = vector.shape_cast %24 : vector<4x2xf32> to vector<4x2x1xf32>
    %26 = vector.broadcast %25 : vector<4x2x1xf32> to vector<4x2x2xf32>
    %27 = arith.divf %23, %26 : vector<4x2x2xf32>
    "tpu.trace_start"() <{level = 10 : i32, message = "sbc,scv->sbv"}> : () -> ()
    %cst_16 = arith.constant dense<0.000000e+00> : vector<4x2x8xf32>
    %28 = tpu.matmul %27, %15, %cst_16 {dimension_numbers = #tpu.dot_dimension_numbers<[2], [1], [1], [2], [0, 0, 0, 1, 1, 2], [0], [0]>} : vector<4x2x2xf32>, vector<4x2x8xf32>, vector<4x2x8xf32> -> vector<4x2x8xf32>
    "tpu.trace_stop"() : () -> ()
    %29 = vector.shape_cast %28 : vector<4x2x8xf32> to vector<8x8xf32>
    %30 = vector.extract_strided_slice %1 {offsets = [1, 0, 0], sizes = [1, 32, 8], strides = [1, 1, 1]} : vector<4x32x8xf32> to vector<1x32x8xf32>
    %31 = vector.shape_cast %30 : vector<1x32x8xf32> to vector<32x8xf32>
    %cst_17 = arith.constant dense<0.000000e+00> : vector<8x8xf32>
    %32 = tpu.matmul %0, %31, %cst_17 {dimension_numbers = #tpu.dot_dimension_numbers<[1], [0], [0], [1], [0, 0, 1, 1], [], []>} : vector<8x32xf32>, vector<32x8xf32>, vector<8x8xf32> -> vector<8x8xf32>
    %33 = vector.extract_strided_slice %2 {offsets = [1, 0, 0], sizes = [1, 32, 8], strides = [1, 1, 1]} : vector<4x32x8xf32> to vector<1x32x8xf32>
    %34 = vector.shape_cast %33 : vector<1x32x8xf32> to vector<32x8xf32>
    %cst_18 = arith.constant dense<0.000000e+00> : vector<8x8xf32>
    %35 = tpu.matmul %0, %34, %cst_18 {dimension_numbers = #tpu.dot_dimension_numbers<[1], [0], [0], [1], [0, 0, 1, 1], [], []>} : vector<8x32xf32>, vector<32x8xf32>, vector<8x8xf32> -> vector<8x8xf32>
    %36 = vector.extract_strided_slice %3 {offsets = [1, 0, 0], sizes = [1, 32, 8], strides = [1, 1, 1]} : vector<4x32x8xf32> to vector<1x32x8xf32>
    %37 = vector.shape_cast %36 : vector<1x32x8xf32> to vector<32x8xf32>
    %cst_19 = arith.constant dense<0.000000e+00> : vector<8x8xf32>
    %38 = tpu.matmul %0, %37, %cst_19 {dimension_numbers = #tpu.dot_dimension_numbers<[1], [0], [0], [1], [0, 0, 1, 1], [], []>} : vector<8x32xf32>, vector<32x8xf32>, vector<8x8xf32> -> vector<8x8xf32>
    %39 = vector.shape_cast %32 : vector<8x8xf32> to vector<4x2x8xf32>
    %40 = vector.shape_cast %35 : vector<8x8xf32> to vector<4x2x8xf32>
    %41 = vector.shape_cast %38 : vector<8x8xf32> to vector<4x2x8xf32>
    "tpu.trace_start"() <{level = 10 : i32, message = "sbk,sck->sbc"}> : () -> ()
    %cst_20 = arith.constant dense<0.000000e+00> : vector<4x2x2xf32>
    %42 = tpu.matmul %39, %40, %cst_20 {dimension_numbers = #tpu.dot_dimension_numbers<[2], [2], [1], [1], [0, 0, 0, 1, 1, 1], [0], [0]>} : vector<4x2x8xf32>, vector<4x2x8xf32>, vector<4x2x2xf32> -> vector<4x2x2xf32>
    "tpu.trace_stop"() : () -> ()
    %cst_21 = arith.constant 0.176776692 : f32
    %43 = vector.broadcast %cst_21 : f32 to vector<4x2x2xf32>
    %44 = arith.mulf %42, %43 : vector<4x2x2xf32>
    %cst_22 = arith.constant dense<0xFF800000> : vector<4x2xf32>
    %45 = vector.multi_reduction <maximumf>, %44, %cst_22 [2] : vector<4x2x2xf32> to vector<4x2xf32>
    %46 = vector.shape_cast %45 : vector<4x2xf32> to vector<4x2x1xf32>
    %47 = vector.broadcast %46 : vector<4x2x1xf32> to vector<4x2x2xf32>
    %48 = arith.subf %44, %47 : vector<4x2x2xf32>
    %49 = math.exp %48 : vector<4x2x2xf32>
    %cst_23 = arith.constant dense<0.000000e+00> : vector<4x2xf32>
    %50 = vector.multi_reduction <add>, %49, %cst_23 [2] : vector<4x2x2xf32> to vector<4x2xf32>
    %51 = vector.shape_cast %50 : vector<4x2xf32> to vector<4x2x1xf32>
    %52 = vector.broadcast %51 : vector<4x2x1xf32> to vector<4x2x2xf32>
    %53 = arith.divf %49, %52 : vector<4x2x2xf32>
    "tpu.trace_start"() <{level = 10 : i32, message = "sbc,scv->sbv"}> : () -> ()
    %cst_24 = arith.constant dense<0.000000e+00> : vector<4x2x8xf32>
    %54 = tpu.matmul %53, %41, %cst_24 {dimension_numbers = #tpu.dot_dimension_numbers<[2], [1], [1], [2], [0, 0, 0, 1, 1, 2], [0], [0]>} : vector<4x2x2xf32>, vector<4x2x8xf32>, vector<4x2x8xf32> -> vector<4x2x8xf32>
    "tpu.trace_stop"() : () -> ()
    %55 = vector.shape_cast %54 : vector<4x2x8xf32> to vector<8x8xf32>
    %56 = vector.extract_strided_slice %1 {offsets = [2, 0, 0], sizes = [1, 32, 8], strides = [1, 1, 1]} : vector<4x32x8xf32> to vector<1x32x8xf32>
    %57 = vector.shape_cast %56 : vector<1x32x8xf32> to vector<32x8xf32>
    %cst_25 = arith.constant dense<0.000000e+00> : vector<8x8xf32>
    %58 = tpu.matmul %0, %57, %cst_25 {dimension_numbers = #tpu.dot_dimension_numbers<[1], [0], [0], [1], [0, 0, 1, 1], [], []>} : vector<8x32xf32>, vector<32x8xf32>, vector<8x8xf32> -> vector<8x8xf32>
    %59 = vector.extract_strided_slice %2 {offsets = [2, 0, 0], sizes = [1, 32, 8], strides = [1, 1, 1]} : vector<4x32x8xf32> to vector<1x32x8xf32>
    %60 = vector.shape_cast %59 : vector<1x32x8xf32> to vector<32x8xf32>
    %cst_26 = arith.constant dense<0.000000e+00> : vector<8x8xf32>
    %61 = tpu.matmul %0, %60, %cst_26 {dimension_numbers = #tpu.dot_dimension_numbers<[1], [0], [0], [1], [0, 0, 1, 1], [], []>} : vector<8x32xf32>, vector<32x8xf32>, vector<8x8xf32> -> vector<8x8xf32>
    %62 = vector.extract_strided_slice %3 {offsets = [2, 0, 0], sizes = [1, 32, 8], strides = [1, 1, 1]} : vector<4x32x8xf32> to vector<1x32x8xf32>
    %63 = vector.shape_cast %62 : vector<1x32x8xf32> to vector<32x8xf32>
    %cst_27 = arith.constant dense<0.000000e+00> : vector<8x8xf32>
    %64 = tpu.matmul %0, %63, %cst_27 {dimension_numbers = #tpu.dot_dimension_numbers<[1], [0], [0], [1], [0, 0, 1, 1], [], []>} : vector<8x32xf32>, vector<32x8xf32>, vector<8x8xf32> -> vector<8x8xf32>
    %65 = vector.shape_cast %58 : vector<8x8xf32> to vector<4x2x8xf32>
    %66 = vector.shape_cast %61 : vector<8x8xf32> to vector<4x2x8xf32>
    %67 = vector.shape_cast %64 : vector<8x8xf32> to vector<4x2x8xf32>
    "tpu.trace_start"() <{level = 10 : i32, message = "sbk,sck->sbc"}> : () -> ()
    %cst_28 = arith.constant dense<0.000000e+00> : vector<4x2x2xf32>
    %68 = tpu.matmul %65, %66, %cst_28 {dimension_numbers = #tpu.dot_dimension_numbers<[2], [2], [1], [1], [0, 0, 0, 1, 1, 1], [0], [0]>} : vector<4x2x8xf32>, vector<4x2x8xf32>, vector<4x2x2xf32> -> vector<4x2x2xf32>
    "tpu.trace_stop"() : () -> ()
    %cst_29 = arith.constant 0.176776692 : f32
    %69 = vector.broadcast %cst_29 : f32 to vector<4x2x2xf32>
    %70 = arith.mulf %68, %69 : vector<4x2x2xf32>
    %cst_30 = arith.constant dense<0xFF800000> : vector<4x2xf32>
    %71 = vector.multi_reduction <maximumf>, %70, %cst_30 [2] : vector<4x2x2xf32> to vector<4x2xf32>
    %72 = vector.shape_cast %71 : vector<4x2xf32> to vector<4x2x1xf32>
    %73 = vector.broadcast %72 : vector<4x2x1xf32> to vector<4x2x2xf32>
    %74 = arith.subf %70, %73 : vector<4x2x2xf32>
    %75 = math.exp %74 : vector<4x2x2xf32>
    %cst_31 = arith.constant dense<0.000000e+00> : vector<4x2xf32>
    %76 = vector.multi_reduction <add>, %75, %cst_31 [2] : vector<4x2x2xf32> to vector<4x2xf32>
    %77 = vector.shape_cast %76 : vector<4x2xf32> to vector<4x2x1xf32>
    %78 = vector.broadcast %77 : vector<4x2x1xf32> to vector<4x2x2xf32>
    %79 = arith.divf %75, %78 : vector<4x2x2xf32>
    "tpu.trace_start"() <{level = 10 : i32, message = "sbc,scv->sbv"}> : () -> ()
    %cst_32 = arith.constant dense<0.000000e+00> : vector<4x2x8xf32>
    %80 = tpu.matmul %79, %67, %cst_32 {dimension_numbers = #tpu.dot_dimension_numbers<[2], [1], [1], [2], [0, 0, 0, 1, 1, 2], [0], [0]>} : vector<4x2x2xf32>, vector<4x2x8xf32>, vector<4x2x8xf32> -> vector<4x2x8xf32>
    "tpu.trace_stop"() : () -> ()
    %81 = vector.shape_cast %80 : vector<4x2x8xf32> to vector<8x8xf32>
    %82 = vector.extract_strided_slice %1 {offsets = [3, 0, 0], sizes = [1, 32, 8], strides = [1, 1, 1]} : vector<4x32x8xf32> to vector<1x32x8xf32>
    %83 = vector.shape_cast %82 : vector<1x32x8xf32> to vector<32x8xf32>
    %cst_33 = arith.constant dense<0.000000e+00> : vector<8x8xf32>
    %84 = tpu.matmul %0, %83, %cst_33 {dimension_numbers = #tpu.dot_dimension_numbers<[1], [0], [0], [1], [0, 0, 1, 1], [], []>} : vector<8x32xf32>, vector<32x8xf32>, vector<8x8xf32> -> vector<8x8xf32>
    %85 = vector.extract_strided_slice %2 {offsets = [3, 0, 0], sizes = [1, 32, 8], strides = [1, 1, 1]} : vector<4x32x8xf32> to vector<1x32x8xf32>
    %86 = vector.shape_cast %85 : vector<1x32x8xf32> to vector<32x8xf32>
    %cst_34 = arith.constant dense<0.000000e+00> : vector<8x8xf32>
    %87 = tpu.matmul %0, %86, %cst_34 {dimension_numbers = #tpu.dot_dimension_numbers<[1], [0], [0], [1], [0, 0, 1, 1], [], []>} : vector<8x32xf32>, vector<32x8xf32>, vector<8x8xf32> -> vector<8x8xf32>
    %88 = vector.extract_strided_slice %3 {offsets = [3, 0, 0], sizes = [1, 32, 8], strides = [1, 1, 1]} : vector<4x32x8xf32> to vector<1x32x8xf32>
    %89 = vector.shape_cast %88 : vector<1x32x8xf32> to vector<32x8xf32>
    %cst_35 = arith.constant dense<0.000000e+00> : vector<8x8xf32>
    %90 = tpu.matmul %0, %89, %cst_35 {dimension_numbers = #tpu.dot_dimension_numbers<[1], [0], [0], [1], [0, 0, 1, 1], [], []>} : vector<8x32xf32>, vector<32x8xf32>, vector<8x8xf32> -> vector<8x8xf32>
    %91 = vector.shape_cast %84 : vector<8x8xf32> to vector<4x2x8xf32>
    %92 = vector.shape_cast %87 : vector<8x8xf32> to vector<4x2x8xf32>
    %93 = vector.shape_cast %90 : vector<8x8xf32> to vector<4x2x8xf32>
    "tpu.trace_start"() <{level = 10 : i32, message = "sbk,sck->sbc"}> : () -> ()
    %cst_36 = arith.constant dense<0.000000e+00> : vector<4x2x2xf32>
    %94 = tpu.matmul %91, %92, %cst_36 {dimension_numbers = #tpu.dot_dimension_numbers<[2], [2], [1], [1], [0, 0, 0, 1, 1, 1], [0], [0]>} : vector<4x2x8xf32>, vector<4x2x8xf32>, vector<4x2x2xf32> -> vector<4x2x2xf32>
    "tpu.trace_stop"() : () -> ()
    %cst_37 = arith.constant 0.176776692 : f32
    %95 = vector.broadcast %cst_37 : f32 to vector<4x2x2xf32>
    %96 = arith.mulf %94, %95 : vector<4x2x2xf32>
    %cst_38 = arith.constant dense<0xFF800000> : vector<4x2xf32>
    %97 = vector.multi_reduction <maximumf>, %96, %cst_38 [2] : vector<4x2x2xf32> to vector<4x2xf32>
    %98 = vector.shape_cast %97 : vector<4x2xf32> to vector<4x2x1xf32>
    %99 = vector.broadcast %98 : vector<4x2x1xf32> to vector<4x2x2xf32>
    %100 = arith.subf %96, %99 : vector<4x2x2xf32>
    %101 = math.exp %100 : vector<4x2x2xf32>
    %cst_39 = arith.constant dense<0.000000e+00> : vector<4x2xf32>
    %102 = vector.multi_reduction <add>, %101, %cst_39 [2] : vector<4x2x2xf32> to vector<4x2xf32>
    %103 = vector.shape_cast %102 : vector<4x2xf32> to vector<4x2x1xf32>
    %104 = vector.broadcast %103 : vector<4x2x1xf32> to vector<4x2x2xf32>
    %105 = arith.divf %101, %104 : vector<4x2x2xf32>
    "tpu.trace_start"() <{level = 10 : i32, message = "sbc,scv->sbv"}> : () -> ()
    %cst_40 = arith.constant dense<0.000000e+00> : vector<4x2x8xf32>
    %106 = tpu.matmul %105, %93, %cst_40 {dimension_numbers = #tpu.dot_dimension_numbers<[2], [1], [1], [2], [0, 0, 0, 1, 1, 2], [0], [0]>} : vector<4x2x2xf32>, vector<4x2x8xf32>, vector<4x2x8xf32> -> vector<4x2x8xf32>
    "tpu.trace_stop"() : () -> ()
    %107 = vector.shape_cast %106 : vector<4x2x8xf32> to vector<8x8xf32>
    %108 = tpu.concatenate %29, %55, %81, %107 in 1 : vector<8x8xf32>, vector<8x8xf32>, vector<8x8xf32>, vector<8x8xf32> -> vector<8x32xf32>
    %109 = arith.addf %0, %108 : vector<8x32xf32>
    %c0_41 = arith.constant 0 : index
    %c0_42 = arith.constant 0 : index
    %110 = vector.load %arg5[%c0_41, %c0_42] : memref<1x32xf32, #tpu.memory_space<vmem>>, vector<1x32xf32>
    %c0_43 = arith.constant 0 : index
    %c0_44 = arith.constant 0 : index
    %111 = vector.load %arg6[%c0_43, %c0_44] : memref<1x32xf32, #tpu.memory_space<vmem>>, vector<1x32xf32>
    %cst_45 = arith.constant dense<0.000000e+00> : vector<8xf32>
    %112 = vector.multi_reduction <add>, %109, %cst_45 [1] : vector<8x32xf32> to vector<8xf32>
    %113 = vector.shape_cast %112 : vector<8xf32> to vector<8x1xf32>
    %cst_46 = arith.constant 3.200000e+01 : f32
    %114 = vector.broadcast %cst_46 : f32 to vector<8x1xf32>
    %115 = arith.divf %113, %114 : vector<8x1xf32>
    %116 = vector.broadcast %115 : vector<8x1xf32> to vector<8x32xf32>
    %117 = arith.subf %109, %116 : vector<8x32xf32>
    %118 = arith.mulf %117, %117 : vector<8x32xf32>
    %cst_47 = arith.constant dense<0.000000e+00> : vector<8xf32>
    %119 = vector.multi_reduction <add>, %118, %cst_47 [1] : vector<8x32xf32> to vector<8xf32>
    %120 = vector.shape_cast %119 : vector<8xf32> to vector<8x1xf32>
    %cst_48 = arith.constant 3.200000e+01 : f32
    %121 = vector.broadcast %cst_48 : f32 to vector<8x1xf32>
    %122 = arith.divf %120, %121 : vector<8x1xf32>
    %123 = vector.broadcast %115 : vector<8x1xf32> to vector<8x32xf32>
    %124 = arith.subf %109, %123 : vector<8x32xf32>
    %cst_49 = arith.constant 9.99999974E-6 : f32
    %125 = vector.broadcast %cst_49 : f32 to vector<8x1xf32>
    %126 = arith.addf %122, %125 : vector<8x1xf32>
    %127 = math.rsqrt %126 : vector<8x1xf32>
    %128 = vector.broadcast %127 : vector<8x1xf32> to vector<8x32xf32>
    %129 = arith.mulf %124, %128 : vector<8x32xf32>
    %130 = vector.broadcast %110 : vector<1x32xf32> to vector<8x32xf32>
    %131 = arith.mulf %129, %130 : vector<8x32xf32>
    %132 = vector.broadcast %111 : vector<1x32xf32> to vector<8x32xf32>
    %133 = arith.addf %131, %132 : vector<8x32xf32>
    %c0_50 = arith.constant 0 : index
    %c0_51 = arith.constant 0 : index
    %134 = vector.load %arg7[%c0_50, %c0_51] : memref<32x64xf32, #tpu.memory_space<vmem>>, vector<32x64xf32>
    %c0_52 = arith.constant 0 : index
    %c0_53 = arith.constant 0 : index
    %135 = vector.load %arg8[%c0_52, %c0_53] : memref<1x64xf32, #tpu.memory_space<vmem>>, vector<1x64xf32>
    %c0_54 = arith.constant 0 : index
    %c0_55 = arith.constant 0 : index
    %136 = vector.load %arg9[%c0_54, %c0_55] : memref<64x32xf32, #tpu.memory_space<vmem>>, vector<64x32xf32>
    %c0_56 = arith.constant 0 : index
    %c0_57 = arith.constant 0 : index
    %137 = vector.load %arg10[%c0_56, %c0_57] : memref<1x32xf32, #tpu.memory_space<vmem>>, vector<1x32xf32>
    %cst_58 = arith.constant dense<0.000000e+00> : vector<8x64xf32>
    %138 = tpu.matmul %133, %134, %cst_58 {dimension_numbers = #tpu.dot_dimension_numbers<[1], [0], [0], [1], [0, 0, 1, 1], [], []>} : vector<8x32xf32>, vector<32x64xf32>, vector<8x64xf32> -> vector<8x64xf32>
    %139 = vector.broadcast %135 : vector<1x64xf32> to vector<8x64xf32>
    %140 = arith.addf %138, %139 : vector<8x64xf32>
    %cst_59 = arith.constant 0.000000e+00 : f32
    %141 = vector.broadcast %cst_59 : f32 to vector<8x64xf32>
    %142 = arith.maximumf %140, %141 : vector<8x64xf32>
    %cst_60 = arith.constant dense<0.000000e+00> : vector<8x32xf32>
    %143 = tpu.matmul %142, %136, %cst_60 {dimension_numbers = #tpu.dot_dimension_numbers<[1], [0], [0], [1], [0, 0, 1, 1], [], []>} : vector<8x64xf32>, vector<64x32xf32>, vector<8x32xf32> -> vector<8x32xf32>
    %144 = vector.broadcast %137 : vector<1x32xf32> to vector<8x32xf32>
    %145 = arith.addf %143, %144 : vector<8x32xf32>
    %146 = arith.addf %133, %145 : vector<8x32xf32>
    %c0_61 = arith.constant 0 : index
    %c0_62 = arith.constant 0 : index
    %147 = vector.load %arg11[%c0_61, %c0_62] : memref<1x32xf32, #tpu.memory_space<vmem>>, vector<1x32xf32>
    %c0_63 = arith.constant 0 : index
    %c0_64 = arith.constant 0 : index
    %148 = vector.load %arg12[%c0_63, %c0_64] : memref<1x32xf32, #tpu.memory_space<vmem>>, vector<1x32xf32>
    %cst_65 = arith.constant dense<0.000000e+00> : vector<8xf32>
    %149 = vector.multi_reduction <add>, %146, %cst_65 [1] : vector<8x32xf32> to vector<8xf32>
    %150 = vector.shape_cast %149 : vector<8xf32> to vector<8x1xf32>
    %cst_66 = arith.constant 3.200000e+01 : f32
    %151 = vector.broadcast %cst_66 : f32 to vector<8x1xf32>
    %152 = arith.divf %150, %151 : vector<8x1xf32>
    %153 = vector.broadcast %152 : vector<8x1xf32> to vector<8x32xf32>
    %154 = arith.subf %146, %153 : vector<8x32xf32>
    %155 = arith.mulf %154, %154 : vector<8x32xf32>
    %cst_67 = arith.constant dense<0.000000e+00> : vector<8xf32>
    %156 = vector.multi_reduction <add>, %155, %cst_67 [1] : vector<8x32xf32> to vector<8xf32>
    %157 = vector.shape_cast %156 : vector<8xf32> to vector<8x1xf32>
    %cst_68 = arith.constant 3.200000e+01 : f32
    %158 = vector.broadcast %cst_68 : f32 to vector<8x1xf32>
    %159 = arith.divf %157, %158 : vector<8x1xf32>
    %160 = vector.broadcast %152 : vector<8x1xf32> to vector<8x32xf32>
    %161 = arith.subf %146, %160 : vector<8x32xf32>
    %cst_69 = arith.constant 9.99999974E-6 : f32
    %162 = vector.broadcast %cst_69 : f32 to vector<8x1xf32>
    %163 = arith.addf %159, %162 : vector<8x1xf32>
    %164 = math.rsqrt %163 : vector<8x1xf32>
    %165 = vector.broadcast %164 : vector<8x1xf32> to vector<8x32xf32>
    %166 = arith.mulf %161, %165 : vector<8x32xf32>
    %167 = vector.broadcast %147 : vector<1x32xf32> to vector<8x32xf32>
    %168 = arith.mulf %166, %167 : vector<8x32xf32>
    %169 = vector.broadcast %148 : vector<1x32xf32> to vector<8x32xf32>
    %170 = arith.addf %168, %169 : vector<8x32xf32>
    %c0_70 = arith.constant 0 : index
    %c0_71 = arith.constant 0 : index
    %171 = vector.load %arg13[%c0_70, %c0_71] : memref<8x32xf32, #tpu.memory_space<vmem>>, vector<8x32xf32>
    tpu.vector_store %arg13[%c0_70, %c0_71], %170 {strides = array<i32>} : memref<8x32xf32, #tpu.memory_space<vmem>>, vector<8x32xf32>,
    return
  }
  func.func @transform_0(%arg0: i32) -> (i32, i32) {
    %c0_i32 = arith.constant 0 : i32
    %c0_i32_0 = arith.constant 0 : i32
    return %arg0, %c0_i32 : i32, i32
  }
  func.func @transform_1(%arg0: i32) -> (i32, i32, i32) {
    %c0_i32 = arith.constant 0 : i32
    %c0_i32_0 = arith.constant 0 : i32
    %c0_i32_1 = arith.constant 0 : i32
    %c0_i32_2 = arith.constant 0 : i32
    return %c0_i32, %c0_i32_0, %c0_i32_1 : i32, i32, i32
  }
  func.func @transform_2(%arg0: i32) -> (i32, i32, i32) {
    %c0_i32 = arith.constant 0 : i32
    %c0_i32_0 = arith.constant 0 : i32
    %c0_i32_1 = arith.constant 0 : i32
    %c0_i32_2 = arith.constant 0 : i32
    return %c0_i32, %c0_i32_0, %c0_i32_1 : i32, i32, i32
  }
  func.func @transform_3(%arg0: i32) -> (i32, i32, i32) {
    %c0_i32 = arith.constant 0 : i32
    %c0_i32_0 = arith.constant 0 : i32
    %c0_i32_1 = arith.constant 0 : i32
    %c0_i32_2 = arith.constant 0 : i32
    return %c0_i32, %c0_i32_0, %c0_i32_1 : i32, i32, i32
  }
  func.func @transform_4(%arg0: i32) -> (i32, i32) {
    %c0_i32 = arith.constant 0 : i32
    %c0_i32_0 = arith.constant 0 : i32
    %c0_i32_1 = arith.constant 0 : i32
    return %c0_i32, %c0_i32_0 : i32, i32
  }
  func.func @transform_5(%arg0: i32) -> (i32, i32) {
    %c0_i32 = arith.constant 0 : i32
    %c0_i32_0 = arith.constant 0 : i32
    %c0_i32_1 = arith.constant 0 : i32
    return %c0_i32, %c0_i32_0 : i32, i32
  }
  func.func @transform_6(%arg0: i32) -> (i32, i32) {
    %c0_i32 = arith.constant 0 : i32
    %c0_i32_0 = arith.constant 0 : i32
    %c0_i32_1 = arith.constant 0 : i32
    return %c0_i32, %c0_i32_0 : i32, i32
  }
  func.func @transform_7(%arg0: i32) -> (i32, i32) {
    %c0_i32 = arith.constant 0 : i32
    %c0_i32_0 = arith.constant 0 : i32
    %c0_i32_1 = arith.constant 0 : i32
    return %c0_i32, %c0_i32_0 : i32, i32
  }
  func.func @transform_8(%arg0: i32) -> (i32, i32) {
    %c0_i32 = arith.constant 0 : i32
    %c0_i32_0 = arith.constant 0 : i32
    %c0_i32_1 = arith.constant 0 : i32
    return %c0_i32, %c0_i32_0 : i32, i32
  }
  func.func @transform_9(%arg0: i32) -> (i32, i32) {
    %c0_i32 = arith.constant 0 : i32
    %c0_i32_0 = arith.constant 0 : i32
    %c0_i32_1 = arith.constant 0 : i32
    return %c0_i32, %c0_i32_0 : i32, i32
  }
  func.func @transform_10(%arg0: i32) -> (i32, i32) {
    %c0_i32 = arith.constant 0 : i32
    %c0_i32_0 = arith.constant 0 : i32
    %c0_i32_1 = arith.constant 0 : i32
    return %c0_i32, %c0_i32_0 : i32, i32
  }
  func.func @transform_11(%arg0: i32) -> (i32, i32) {
    %c0_i32 = arith.constant 0 : i32
    %c0_i32_0 = arith.constant 0 : i32
    %c0_i32_1 = arith.constant 0 : i32
    return %c0_i32, %c0_i32_0 : i32, i32
  }
  func.func @transform_12(%arg0: i32) -> (i32, i32) {
    %c0_i32 = arith.constant 0 : i32
    %c0_i32_0 = arith.constant 0 : i32
    return %arg0, %c0_i32 : i32, i32
  }
}

</mosaic_0001>

<bundles_post_ra>
// kernel: tpu_custom_call.1
= control target key start
LH: loop header
LB: loop body
LE: loop exit
PB: predicated region body
PF: predicated region fallthrough
CT: control target
= control target key end

     0   :  { %s6071_s0 = inlined_call_operand.vmem [shape: f32[32,32], index: 0, kind: input, shape index: {}]   ;;  %s6072_s1 = inlined_call_operand.vmem [shape: f32[4,32,8], index: 1, kind: input, shape index: {}]   ;;  %s6073_s2 = inlined_call_operand.vmem [shape: f32[4,32,8], index: 2, kind: input, shape index: {}]   ;;  %s6074_s3 = inlined_call_operand.vmem [shape: f32[4,32,8], index: 3, kind: input, shape index: {}]   ;;  %s6075_s4 = inlined_call_operand.vmem [shape: f32[1,32], index: 4, kind: input, shape index: {}]   ;;  %s6076_s5 = inlined_call_operand.vmem [shape: f32[1,32], index: 5, kind: input, shape index: {}]   ;;  %s6077_s6 = inlined_call_operand.vmem [shape: f32[32,64], index: 6, kind: input, shape index: {}]   ;;  %s6078_s7 = inlined_call_operand.vmem [shape: f32[1,64], index: 7, kind: input, shape index: {}]   ;;  %s6079_s8 = inlined_call_operand.vmem [shape: f32[64,32], index: 8, kind: input, shape index: {}]   ;;  %s6080_s9 = inlined_call_operand.vmem [shape: f32[1,32], index: 9, kind: input, shape index: {}]   ;;  %s6081_s10 = inlined_call_operand.vmem [shape: f32[1,32], index: 10, kind: input, shape index: {}]   ;;  %s6082_s11 = inlined_call_operand.vmem [shape: f32[1,32], index: 11, kind: input, shape index: {}]   ;;  %s6083_s12 = inlined_call_operand.hbm [shape: f32[32,32], index: 12, kind: output, shape index: {}]  }
   0x1   :  { %6084 = sst [smem:[#allocation6_spill]] %s6071_s0 }
   0x2   :  { %6085 = sst [smem:[#allocation7_spill]] %s6072_s1 }
   0x3   :  { %17 = vsyncpa [#allocation3], 0 }
   0x4   :  { %19 = vsyncpa [#allocation3 + $0x1], 0  ;;  %s5402_s21 = smov 0   ;;  %s5404_s22 = smov 0  }
   0x5   :  { %s5406_s23 = smov 0   ;;  %s5408_s24 = smov 0  }
   0x6 LB: > { %s5423_s25 = sadd.s32 4294967295, %s5327_s24   ;;  %s4506_s26 = sadd.s32 4294967294, %s5327_s24   ;;  %s5327_s24 = sphi %s5408_s24, %s6095_s24   ;;  %s5323_s23 = sphi %s5406_s23, %s6094_s23   ;;  %s5319_s22 = sphi %s5404_s22, %s6093_s22   ;;  %s5315_s21 = sphi %s5402_s21, %s6092_s21  }
   0x7   : > { %s5427_s27 = sadd.s32 1, %s5327_s24   ;;  %s289_s28 = sadd.s32 1, %s5323_s23 }
   0x8   : > { %s286_s29 = ssub.s32 %s5327_s24, %s5427_s27  ;;  %p299_p0 = scmp.ne.s32.totalorder %s5323_s23, %s5319_s22 }
   0x9   : > { %p287_p1 = scmp.eq.s32.totalorder %s286_s29, 0  ;;  %p300_p2 = scmp.eq.s32.totalorder %s5423_s25, 3 }
   0xa   : > { %p305_p3 = scmp.ne.s32.totalorder %s5319_s22, %s5315_s21  ;;  %p306_p4 = scmp.eq.s32.totalorder %s4506_s26, 3 }
   0xb   : > { %s5438_s30 = scalar_select %p287_p1, %s5323_s23, %s289_s28  }
   0xc   : > { %p5440_p5 = por %p300_p2, %p299_p0  ;;  %p5444_p6 = por %p306_p4, %p305_p3 }
   0xd   : > { %6086 = sst [smem:[#allocation5_spill]] %s5438_s30  ;;  %p4509_p7 = scmp.ge.s32.totalorder %s5327_s24, 1 }
   0xe   : > { %p364_p8 = scmp.lt.s32.totalorder %s5327_s24, 5 }
  0x10   : > { %p365_p9 = pnand %p4509_p7, %p364_p8 }
  0x11   : > { %v426_v0 = vld [vmem:[%s6073_s2] sm:$0xff] (!%p365_p9)  ;;  %v427_v1 = vld [vmem:[%s6073_s2 + $0x8] sm:$0xff] (!%p365_p9)  ;;  %s6089_s1 = sld [smem:[#allocation7_spill]] (!%p365_p9)  ;;  %v5329_v3 = vmov (!%p365_p9), 0.0|0.0   ;;  %v428_v6 = vld [vmem:[%s6073_s2 + $0x10] sm:$0xff] (!%p365_p9)  ;;  %p405_p10 = scmp.lt.s32.totalorder (!%p365_p9), %s5423_s25, 3  ;;  %v677_v23 = vlaneseq (!%p365_p9) }
  0x12   : > { %368 = sbr.rel (%p365_p9) target bundleno = 4474 (0x117a), region = 68  ;;  %5066 = vmatprep.subr.bf16.mxu1 (!%p365_p9), %v5329_v3  ;;  %v5067_v4 = vpack.c.bf16 (!%p365_p9), %v427_v1, %v426_v0  ;;  %5060 = vmatprep.subr.bf16.mxu0 (!%p365_p9), %v5329_v3  ;;  %v429_v7 = vld [vmem:[%s6073_s2 + $0x18] sm:$0xff] (!%p365_p9)  ;;  %vm5330_vm0 = vmmov (!%p365_p9), 0   ;;  %v5331_v11 = vmov (!%p365_p9), 0.0   ;;  %v442_v14 = vld [vmem:[%s6074_s3] sm:$0xff] (!%p365_p9)  ;;  %v443_v15 = vld [vmem:[%s6074_s3 + $0x8] sm:$0xff] (!%p365_p9) }
  0x13   : > { %4757 = vmatprep.mubr.msk.f32.mxu1 (!%p365_p9), %vm5330_vm0, %v5331_v11  ;;  %4746 = vmatprep.mubr.msk.f32.mxu0 (!%p365_p9), %vm5330_vm0, %v5331_v11  ;;  %v5070_v12 = vpack.c.bf16 (!%p365_p9), %v429_v7, %v428_v6  ;;  %s6090_s0 = sld [smem:[#allocation6_spill]] (!%p365_p9)  ;;  %vm458_vm1 = vcmask (!%p365_p9), 261120   ;;  %v5073_v17 = vpack.c.bf16 (!%p365_p9), %v443_v15, %v442_v14  ;;  %v444_v18 = vld [vmem:[%s6074_s3 + $0x10] sm:$0xff] (!%p365_p9)  ;;  %v445_v19 = vld [vmem:[%s6074_s3 + $0x18] sm:$0xff] (!%p365_p9)  ;;  %v5332_v21 = vmov (!%p365_p9), 1983009808  }
  0x14   : > { %5068 = vmatpush3.bf16.msra.mxu1 (!%p365_p9), %v5067_v4  ;;  %v5076_v20 = vpack.c.bf16 (!%p365_p9), %v445_v19, %v444_v18  ;;  %v675_v22 = vunpack.c.l.s4 (!%p365_p9), %v5332_v21  ;;  %v678_v25 = vshrl.u32 (!%p365_p9), %v677_v23, 7  ;;  %vm726_vm2 = vcmask (!%p365_p9), 64512   ;;  %s5335_s15 = smov (!%p365_p9), 24   ;;  %s402_s18 = sand.u32 (!%p365_p9), 1, %s5319_s22  }
  0x15   : > { %5069 = vmatprep.subr.bf16.mxu1 (!%p365_p9), %v5329_v3  ;;  %vm1076_vm3 = vcmask (!%p365_p9), 1041408   ;;  %vm1027_vm4 = vcmask (!%p365_p9), 9216   ;;  %vm1072_vm5 = vcmask (!%p365_p9), 15360   ;;  %vm4193_vm6 = vcmask (!%p365_p9), 130048   ;;  %s4510_s20 = sshll.u32 (!%p365_p9), %s402_s18, 3 }
  0x16   : > { %v676_v24 = vunpack.c.0.s8 (!%p365_p9), %v675_v22  ;;  %vm4195_vm7 = vcmask (!%p365_p9), 195584   ;;  %vm4328_vm8 = vcmask (!%p365_p9), 523264  }
  0x17   : > { %v410_v2 = vld [vmem:[%s6089_s1] sm:$0xff] (!%p365_p9)  ;;  %v411_v5 = vld [vmem:[%s6089_s1 + $0x8] sm:$0xff] (!%p365_p9)  ;;  %v412_v9 = vld [vmem:[%s6089_s1 + $0x10] sm:$0xff] (!%p365_p9) }
  0x18   : > { %v5061_v8 = vpack.c.bf16 (!%p365_p9), %v411_v5, %v410_v2  ;;  %v413_v10 = vld [vmem:[%s6089_s1 + $0x18] sm:$0xff] (!%p365_p9)  ;;  %5071 = vmatpush3.bf16.msra.mxu1 (!%p365_p9), %v5070_v12  ;;  %v5520_v26 = vsub.s32 (!%p365_p9), %v676_v24, %v678_v25 }
  0x19   : > { %s406_s26 = scalar_select %p405_p10, %s5423_s25, 3  ;;  %v5064_v13 = vpack.c.bf16 %v413_v10, %v412_v9  ;;  %4776 = vmatprep.subr.mxu1 %v5331_v11 }
  0x1a   : > { %5062 = vmatpush3.bf16.msra.mxu0 %v5061_v8 }
  0x1b   : > { %5063 = vmatprep.subr.bf16.mxu0 %v5329_v3  ;;  %s4511_s28 = sshll.u32 %s406_s26, 3  ;;  %s4434_s26 = scalar_lea.sflag [#allocation3], %s402_s18 }
  0x1c   : > { %s5493_s19 = scalar_lea.vmem %s6090_s0, %s4511_s28  ;;  %s5334_s28 = smov 8  }
  0x1d   : > { %v5496_v16 = vld [vmem:[%s5493_s19] sm:$0xff] }
  0x1e   : > { %5065 = vmatpush3.bf16.msra.mxu0 %v5064_v13  ;;  %4758 = vmatmul.mubr.msk.f32.vlgmr.msra.gmra.mrb[0].mxu1 %vm458_vm1, %v5496_v16 }
  0x1f   : > { %5072 = vmatprep.subr.bf16.mxu0 %v5329_v3  ;;  %4778 = vmatprep.mubr.msk.f32.mxu1 %vm5330_vm0, %v5331_v11 }
  0x21   : > { %4747 = vmatmul.mubr.msk.f32.vlgmr.msra.gmra.mrb[0].mxu0 %vm458_vm1, %v5496_v16 }
  0x22   : > { %5074 = vmatpush3.bf16.msra.mxu0 %v5073_v17  ;;  %4768 = vmatprep.mubr.msk.f32.mxu0 %vm5330_vm0, %v5331_v11 }
  0x23   : > { %5075 = vmatprep.subr.bf16.mxu0 %v5329_v3 }
  0x26   : > { %5077 = vmatpush3.bf16.msra.mxu0 %v5076_v20 }
  0x27   : > { %4771 = vmatprep.subr.mxu0 %v5331_v11 }
  0x29   : > { %4769 = vmatmul.mubr.msk.f32.vlgmr.msra.gmra.mrb[2].mxu0 %vm458_vm1, %v5496_v16 }
  0x2a   : > { %4773 = vmatprep.mubr.msk.f32.mxu0 %vm5330_vm0, %v5331_v11 }
  0xf1   : > { %v598_v27 = vpop.f32.mrb[0].mxu1 }
  0xf2   : > { %v691_v28 = vcombine.high %v598_v27, %v598_v27  ;;  %v698_v29 = vrot.slane %v598_v27, %v5520_v26  ;;  %v4759_v30 = vpop.f32.mrb[1].mxu1 }
  0xf3   : > { %v431_v30 = vld [vmem:[%s6073_s2 + $0x28] sm:$0xff] }
  0xf4   : > { %v528_v31 = vpop.f32.mrb[0].mxu0  ;;  %v705_v35 = vrot.slane %v691_v28, %v5520_v26  ;;  %v706_v36 = vcombine.high %v698_v29, %v698_v29  ;;  %4772 = vmatpush3.xpose.msk.msra.mxu0 %vm726_vm2, %v698_v29  ;;  %v430_v29 = vld [vmem:[%s6073_s2 + $0x20] sm:$0xff] }
  0xf5   : > { %v673_v32 = vcombine.high %v528_v31, %v528_v31  ;;  %v680_v33 = vrot.slane %v528_v31, %v5520_v26  ;;  %v4748_v34 = vpop.f32.mrb[1].mxu0  ;;  %4781 = vmatprep.subr.mxu0 %v5331_v11 }
  0xf6   : > { %4777 = vmatpush3.xpose.msk.msra.mxu1 %vm726_vm2, %v706_v36  ;;  %v707_v39 = vcombine.high %v705_v35, %v705_v35  ;;  %v432_v36 = vld [vmem:[%s6073_s2 + $0x30] sm:$0xff] }
  0xf7   : > { %v688_v37 = vcombine.high %v680_v33, %v680_v33  ;;  %v687_v38 = vrot.slane %v673_v32, %v5520_v26  ;;  %4774 = vmatmul.mubr.msk.f32.vlgmr.msra.gmra.mrb[4].mxu0 %vm726_vm2, %v680_v33  ;;  %4786 = vmatprep.subr.mxu1 %v5331_v11  ;;  %v5085_v33 = vpack.c.bf16 %v431_v30, %v430_v29 }
  0xf8   : > { %4782 = vmatpush3.xpose.msk.msra.mxu0 %vm726_vm2, %v705_v35  ;;  %4783 = vmatprep.mubr.msk.f32.mxu0 %vm5330_vm0, %v5331_v11 }
  0xf9   : > { %4779 = vmatmul.mubr.msk.f32.vlgmr.msra.gmra.mrb[2].mxu1 %vm726_vm2, %v688_v37  ;;  %4791 = vmatprep.subr.mxu0 %v5331_v11  ;;  %v689_v41 = vcombine.high %v687_v38, %v687_v38  ;;  %v433_v37 = vld [vmem:[%s6073_s2 + $0x38] sm:$0xff] }
  0xfa   : > { %4787 = vmatpush3.xpose.msk.msra.mxu1 %vm726_vm2, %v707_v39  ;;  %4788 = vmatprep.mubr.msk.f32.mxu1 %vm5330_vm0, %v5331_v11  ;;  %v414_v39 = vld [vmem:[%s6089_s1 + $0x20] sm:$0xff] }
  0xfb   : > { %4784 = vmatmul.mubr.msk.f32.vlgmr.msra.gmra.mrb[6].mxu0 %vm726_vm2, %v687_v38  ;;  %4796 = vmatprep.subr.mxu1 %v5331_v11 }
  0xfc   : > { %v5539_v40 = vpop.f32.mrb[2].mxu0  ;;  %4793 = vmatprep.mubr.msk.f32.mxu0 %vm5330_vm0, %v5331_v11 }
  0xfd   : > { %v4770_v42 = vpop.f32.mrb[3].mxu0  ;;  %4789 = vmatmul.mubr.msk.f32.vlgmr.msra.gmra.mrb[4].mxu1 %vm726_vm2, %v689_v41  ;;  %v716_v43 = vrot.slane %v5539_v40, %v5520_v26  ;;  %v709_v22 = vcombine.high %v5539_v40, %v5539_v40  ;;  %v415_v40 = vld [vmem:[%s6089_s1 + $0x28] sm:$0xff]  ;;  %v5088_v41 = vpack.c.bf16 %v433_v37, %v432_v36 }
  0xfe   : > { %4798 = vmatprep.mubr.msk.f32.mxu1 %vm5330_vm0, %v5331_v11 }
  0xff   : > { %v724_v44 = vcombine.high %v716_v43, %v716_v43  ;;  %4792 = vmatpush3.msk.msra.mxu0 %vm1076_vm3, %v716_v43  ;;  %v723_v24 = vrot.slane %v709_v22, %v5520_v26  ;;  %v5079_v43 = vpack.c.bf16 %v415_v40, %v414_v39 }
 0x100   : > { %4801 = vmatprep.subr.mxu0 %v5331_v11 }
 0x101   : > { %4797 = vmatpush3.msk.msra.mxu1 %vm1076_vm3, %v724_v44  ;;  %v725_v31 = vcombine.high %v723_v24, %v723_v24 }
 0x102   : > { %4806 = vmatprep.subr.mxu1 %v5331_v11 }
 0x1ca   : > { %v797_v45 = vpop.f32.mrb[4].mxu0 }
 0x1cb   : > { %v4775_v46 = vpop.f32.mrb[5].mxu0  ;;  %v1023_v51 = vmul.f32 0.17677669, %v797_v45  ;;  %v416_v45 = vld [vmem:[%s6089_s1 + $0x30] sm:$0xff] }
 0x1cc   : > { %v871_v47 = vpop.f32.mrb[2].mxu1  ;;  %v417_v46 = vld [vmem:[%s6089_s1 + $0x38] sm:$0xff] }
 0x1cd   : > { %v1024_v48 = vmul.f32 0.17677669, %v871_v47  ;;  %v4780_v49 = vpop.f32.mrb[3].mxu1  ;;  %v1028_v59 = vsel %vm1027_vm4, %v1023_v51, -inf  ;;  %v5082_v47 = vpack.c.bf16 %v417_v46, %v416_v45 }
 0x1ce   : > { %v945_v50 = vpop.f32.mrb[6].mxu0  ;;  %v447_v49 = vld [vmem:[%s6074_s3 + $0x28] sm:$0xff] }
 0x1cf   : > { %v4785_v52 = vpop.f32.mrb[7].mxu0  ;;  %v1031_v53 = vsel %vm1027_vm4, %v1024_v48, -inf  ;;  %v1025_v57 = vmul.f32 0.17677669, %v945_v50 }
 0x1d0   : > { %1032 = vmax.xlane.f32.xlu0 %v1031_v53  ;;  %v1019_v54 = vpop.f32.mrb[4].mxu1  ;;  %v449_v52 = vld [vmem:[%s6074_s3 + $0x38] sm:$0xff] }
 0x1d1   : > { %v1026_v55 = vmul.f32 0.17677669, %v1019_v54  ;;  %v4790_v56 = vpop.f32.mrb[5].mxu1  ;;  %v1034_v60 = vsel %vm1027_vm4, %v1025_v57, -inf }
 0x1d3   : > { %v1037_v58 = vsel %vm1027_vm4, %v1026_v55, -inf }
 0x1d4   : > { %1038 = vmax.xlane.f32.xlu1 %v1037_v58  ;;  %1029 = vmax.xlane.f32.xlu0 %v1028_v59 }
 0x1d8   : > { %1035 = vmax.xlane.f32.xlu1 %v1034_v60 }
 0x25d   : > { %v1033_v61 = vpop.xlane.xlu0 %1032 }
 0x25e   : > { %v1041_v62 = vsub.f32 %v1024_v48, %v1033_v61  ;;  %v446_v48 = vld [vmem:[%s6074_s3 + $0x20] sm:$0xff] }
 0x25f   : > { %v5091_v50 = vpack.c.bf16 %v447_v49, %v446_v48 }
 0x260   : > { %v1046_v63 = vmul.f32 1.442695, %v1041_v62 }
 0x261   : > { %v1039_v0 = vpop.xlane.xlu1 %1038  ;;  %v1030_v1 = vpop.xlane.xlu0 %1029 }
 0x262   : > { %5196 = vpow2.f32 %v1046_v63  ;;  %v1043_v2 = vsub.f32 %v1026_v55, %v1039_v0  ;;  %v1040_v4 = vsub.f32 %v1023_v51, %v1030_v1  ;;  %v448_v51 = vld [vmem:[%s6074_s3 + $0x30] sm:$0xff] }
 0x263   : > { %v5094_v53 = vpack.c.bf16 %v449_v52, %v448_v51 }
 0x264   : > { %v1050_v5 = vmul.f32 1.442695, %v1043_v2  ;;  %v1044_v6 = vmul.f32 1.442695, %v1040_v4 }
 0x265   : > { %v1036_v7 = vpop.xlane.xlu1 %1035 }
 0x266   : > { %5198 = vpow2.f32 %v1050_v5  ;;  %v1042_v8 = vsub.f32 %v1025_v57, %v1036_v7 }
 0x267   : > { %5200 = vpow2.f32 %v1044_v6 }
 0x268   : > { %v1048_v9 = vmul.f32 1.442695, %v1042_v8 }
 0x26a   : > { %5202 = vpow2.f32 %v1048_v9 }
 0x26c   : > { %v5197_v10 = vpop.eup %5196 }
 0x26d   : > { %v1055_v12 = vsel %vm1027_vm4, %v5197_v10, 0.0 }
 0x26e   : > { %1056 = vadd.xlane.f32.xlu0 %v1055_v12 }
 0x270   : > { %v5199_v13 = vpop.eup %5198 }
 0x271   : > { %v5201_v14 = vpop.eup %5200  ;;  %v1061_v15 = vsel %vm1027_vm4, %v5199_v13, 0.0 }
 0x272   : > { %1062 = vadd.xlane.f32.xlu0 %v1061_v15  ;;  %v1052_v17 = vsel %vm1027_vm4, %v5201_v14, 0.0 }
 0x273   : > { %1053 = vadd.xlane.f32.xlu1 %v1052_v17 }
 0x274   : > { %v5203_v18 = vpop.eup %5202 }
 0x275   : > { %v1058_v19 = vsel %vm1027_vm4, %v5203_v18, 0.0 }
 0x277   : > { %1059 = vadd.xlane.f32.xlu1 %v1058_v19 }
 0x2fb   : > { %v1057_v20 = vpop.xlane.xlu0 %1056 }
 0x2fc   : > { %5204 = vrcp.f32 %v1057_v20 }
 0x2ff   : > { %v1063_v21 = vpop.xlane.xlu0 %1062 }
 0x300   : > { %5206 = vrcp.f32 %v1063_v21  ;;  %v1054_v23 = vpop.xlane.xlu1 %1053 }
 0x301   : > { %5208 = vrcp.f32 %v1054_v23 }
 0x304   : > { %v1060_v25 = vpop.xlane.xlu1 %1059 }
 0x305   : > { %5210 = vrcp.f32 %v1060_v25 }
 0x306   : > { %v5205_v27 = vpop.eup %5204 }
 0x307   : > { %v1067_v28 = vmul.f32 %v5205_v27, %v5197_v10 }
 0x309   : > { %4799 = vmatmul.mubr.msk.f32.vlgmr.msra.gmra.mrb[6].mxu1 %vm1072_vm5, %v1067_v28 }
 0x30a   : > { %v5207_v32 = vpop.eup %5206  ;;  %4807 = vmatpush3.msk.msra.mxu1 %vm1076_vm3, %v725_v31  ;;  %4808 = vmatprep.mubr.msk.f32.mxu1 %vm5330_vm0, %v5331_v11 }
 0x30b   : > { %v5209_v34 = vpop.eup %5208  ;;  %v1071_v35 = vmul.f32 %v5207_v32, %v5199_v13  ;;  %5084 = vmatprep.subr.bf16.mxu1 %v5329_v3 }
 0x30c   : > { %v1065_v38 = vmul.f32 %v5209_v34, %v5201_v14 }
 0x30d   : > { %4809 = vmatmul.mubr.msk.f32.vlgmr.msra.gmra.mrb[8].mxu1 %vm1072_vm5, %v1071_v35 }
 0x30e   : > { %4794 = vmatmul.mubr.msk.f32.vlgmr.msra.gmra.mrb[8].mxu0 %vm1072_vm5, %v1065_v38  ;;  %5086 = vmatpush3.bf16.msra.mxu1 %v5085_v33 }
 0x30f   : > { %v5211_v42 = vpop.eup %5210  ;;  %4802 = vmatpush3.msk.msra.mxu0 %vm1076_vm3, %v723_v24  ;;  %4803 = vmatprep.mubr.msk.f32.mxu0 %vm5330_vm0, %v5331_v11 }
 0x310   : > { %v1069_v44 = vmul.f32 %v5211_v42, %v5203_v18  ;;  %5078 = vmatprep.subr.bf16.mxu0 %v5329_v3  ;;  %5087 = vmatprep.subr.bf16.mxu1 %v5329_v3 }
 0x311   : > { %4830 = vmatprep.mubr.msk.f32.mxu1 %vm5330_vm0, %v5331_v11 }
 0x312   : > { %4804 = vmatmul.mubr.msk.f32.vlgmr.msra.gmra.mrb[10].mxu0 %vm1072_vm5, %v1069_v44  ;;  %5089 = vmatpush3.bf16.msra.mxu1 %v5088_v41 }
 0x313   : > { %5080 = vmatpush3.bf16.msra.mxu0 %v5079_v43  ;;  %4819 = vmatprep.mubr.msk.f32.mxu0 %vm5330_vm0, %v5331_v11 }
 0x314   : > { %5081 = vmatprep.subr.bf16.mxu0 %v5329_v3  ;;  %4844 = vmatprep.subr.mxu1 %v5331_v11 }
 0x315   : > { %4831 = vmatmul.mubr.msk.f32.vlgmr.msra.gmra.mrb[10].mxu1 %vm458_vm1, %v5496_v16 }
 0x316   : > { %4846 = vmatprep.mubr.msk.f32.mxu1 %vm5330_vm0, %v5331_v11 }
 0x317   : > { %5083 = vmatpush3.bf16.msra.mxu0 %v5082_v47 }
 0x318   : > { %5090 = vmatprep.subr.bf16.mxu0 %v5329_v3 }
 0x31a   : > { %4820 = vmatmul.mubr.msk.f32.vlgmr.msra.gmra.mrb[12].mxu0 %vm458_vm1, %v5496_v16 }
 0x31b   : > { %4841 = vmatprep.mubr.msk.f32.mxu0 %vm5330_vm0, %v5331_v11  ;;  %5092 = vmatpush3.bf16.msra.mxu0 %v5091_v50 }
 0x31c   : > { %5093 = vmatprep.subr.bf16.mxu0 %v5329_v3 }
 0x31f   : > { %5095 = vmatpush3.bf16.msra.mxu0 %v5094_v53 }
 0x320   : > { %4854 = vmatprep.subr.mxu0 %v5331_v11 }
 0x322   : > { %4842 = vmatmul.mubr.msk.f32.vlgmr.msra.gmra.mrb[14].mxu0 %vm458_vm1, %v5496_v16 }
 0x323   : > { %4856 = vmatprep.mubr.msk.f32.mxu0 %vm5330_vm0, %v5331_v11 }
 0x3dc   : > { %v1220_v54 = vpop.f32.mrb[6].mxu1 }
 0x3dd   : > { %v4800_v55 = vpop.f32.mrb[7].mxu1 }
 0x3e0   : > { %v1370_v56 = vpop.f32.mrb[8].mxu1 }
 0x3e1   : > { %v1145_v57 = vpop.f32.mrb[8].mxu0  ;;  %v4810_v58 = vpop.f32.mrb[9].mxu1 }
 0x3e2   : > { %v4102_v59 = vcombine.low %v1145_v57, %v1220_v54  ;;  %v4795_v60 = vpop.f32.mrb[9].mxu0 }
 0x3e4   : > { %v5636_v0 = vrot.slane %v4102_v59, %v5520_v26 }
 0x3e5   : > { %v1295_v61 = vpop.f32.mrb[10].mxu0 }
 0x3e6   : > { %v4103_v62 = vcombine.low %v1295_v61, %v1370_v56  ;;  %v4805_v63 = vpop.f32.mrb[11].mxu0 }
 0x3e8   : > { %v5639_v1 = vrot.slane %v4103_v62, %v5520_v26  ;;  %v1510_v2 = vpop.f32.mrb[10].mxu1 }
 0x3e9   : > { %v1603_v4 = vcombine.high %v1510_v2, %v1510_v2  ;;  %v1610_v5 = vrot.slane %v1510_v2, %v5520_v26  ;;  %v4832_v6 = vpop.f32.mrb[11].mxu1 }
 0x3ea   : > { %v4118_v7 = vcombine.low %v5636_v0, %v5639_v1  ;;  %v4228_v0 = vld [vmem:[%s6077_s6] sm:$0xff]  ;;  %v4229_v1 = vld [vmem:[%s6077_s6 + $0x8] sm:$0xff] }
 0x3eb   : > { %v1617_v8 = vrot.slane %v1603_v4, %v5520_v26  ;;  %4845 = vmatpush3.xpose.msk.msra.mxu1 %vm726_vm2, %v1610_v5  ;;  %v1618_v9 = vcombine.high %v1610_v5, %v1610_v5 }
 0x3ec   : > { %4849 = vmatprep.subr.mxu1 %v5331_v11 }
 0x3ed   : > { %v1440_v10 = vpop.f32.mrb[12].mxu0  ;;  %4855 = vmatpush3.xpose.msk.msra.mxu0 %vm726_vm2, %v1617_v8  ;;  %v1619_v18 = vcombine.high %v1617_v8, %v1617_v8 }
 0x3ee   : > { %v1585_v12 = vcombine.high %v1440_v10, %v1440_v10  ;;  %v1592_v13 = vrot.slane %v1440_v10, %v5520_v26  ;;  %v4821_v14 = vpop.f32.mrb[13].mxu0  ;;  %4864 = vmatprep.subr.mxu0 %v5331_v11  ;;  %v419_v10 = vld [vmem:[%s6089_s1 + $0x48] sm:$0xff] }
 0x3f0   : > { %v1599_v15 = vrot.slane %v1585_v12, %v5520_v26  ;;  %4847 = vmatmul.mubr.msk.f32.vlgmr.msra.gmra.mrb[12].mxu1 %vm726_vm2, %v1592_v13  ;;  %v1600_v17 = vcombine.high %v1592_v13, %v1592_v13 }
 0x3f1   : > { %4850 = vmatpush3.xpose.msk.msra.mxu1 %vm726_vm2, %v1618_v9  ;;  %4851 = vmatprep.mubr.msk.f32.mxu1 %vm5330_vm0, %v5331_v11  ;;  %v418_v9 = vld [vmem:[%s6089_s1 + $0x40] sm:$0xff] }
 0x3f2   : > { %4857 = vmatmul.mubr.msk.f32.vlgmr.msra.gmra.mrb[16].mxu0 %vm726_vm2, %v1599_v15  ;;  %4859 = vmatprep.subr.mxu1 %v5331_v11  ;;  %v1601_v19 = vcombine.high %v1599_v15, %v1599_v15  ;;  %v434_v15 = vld [vmem:[%s6073_s2 + $0x40] sm:$0xff] }
 0x3f3   : > { %4866 = vmatprep.mubr.msk.f32.mxu0 %vm5330_vm0, %v5331_v11 }
 0x3f4   : > { %4852 = vmatmul.mubr.msk.f32.vlgmr.msra.gmra.mrb[14].mxu1 %vm726_vm2, %v1600_v17  ;;  %v435_v17 = vld [vmem:[%s6073_s2 + $0x48] sm:$0xff] }
 0x3f5   : > { %4860 = vmatpush3.xpose.msk.msra.mxu1 %vm726_vm2, %v1619_v18  ;;  %4861 = vmatprep.mubr.msk.f32.mxu1 %vm5330_vm0, %v5331_v11  ;;  %v5667_v20 = vpop.f32.mrb[14].mxu0 }
 0x3f6   : > { %4869 = vmatprep.subr.mxu1 %v5331_v11  ;;  %v1628_v21 = vrot.slane %v5667_v20, %v5520_v26  ;;  %v4843_v22 = vpop.f32.mrb[15].mxu0  ;;  %v1621_v4 = vcombine.high %v5667_v20, %v5667_v20  ;;  %v5097_v20 = vpack.c.bf16 %v419_v10, %v418_v9 }
 0x3f7   : > { %v421_v22 = vld [vmem:[%s6089_s1 + $0x58] sm:$0xff] }
 0x3f8   : > { %4862 = vmatmul.mubr.msk.f32.vlgmr.msra.gmra.mrb[16].mxu1 %vm726_vm2, %v1601_v19  ;;  %v1636_v23 = vcombine.high %v1628_v21, %v1628_v21  ;;  %4865 = vmatpush3.msk.msra.mxu0 %vm1076_vm3, %v1628_v21  ;;  %v1635_v8 = vrot.slane %v1621_v4, %v5520_v26  ;;  %v420_v21 = vld [vmem:[%s6089_s1 + $0x50] sm:$0xff] }
 0x3f9   : > { %4871 = vmatprep.mubr.msk.f32.mxu1 %vm5330_vm0, %v5331_v11  ;;  %4874 = vmatprep.subr.mxu0 %v5331_v11 }
 0x3fa   : > { %4870 = vmatpush3.msk.msra.mxu1 %vm1076_vm3, %v1636_v23  ;;  %v1637_v18 = vcombine.high %v1635_v8, %v1635_v8 }
 0x3fb   : > { %4879 = vmatprep.subr.mxu1 %v5331_v11 }
 0x4c3   : > { %v1708_v24 = vpop.f32.mrb[12].mxu1 }
 0x4c4   : > { %v1934_v25 = vmul.f32 0.17677669, %v1708_v24  ;;  %v4848_v27 = vpop.f32.mrb[13].mxu1  ;;  %v5103_v24 = vpack.c.bf16 %v435_v17, %v434_v15 }
 0x4c5   : > { %v1856_v28 = vpop.f32.mrb[16].mxu0  ;;  %v436_v27 = vld [vmem:[%s6073_s2 + $0x50] sm:$0xff] }
 0x4c6   : > { %v1936_v29 = vmul.f32 0.17677669, %v1856_v28  ;;  %v4858_v30 = vpop.f32.mrb[17].mxu0  ;;  %v1938_v31 = vsel %vm1027_vm4, %v1934_v25, -inf  ;;  %v437_v28 = vld [vmem:[%s6073_s2 + $0x58] sm:$0xff] }
 0x4c7   : > { %1939 = vmax.xlane.f32.xlu1 %v1938_v31  ;;  %v1782_v32 = vpop.f32.mrb[14].mxu1  ;;  %v5106_v30 = vpack.c.bf16 %v437_v28, %v436_v27  ;;  %v450_v31 = vld [vmem:[%s6074_s3 + $0x40] sm:$0xff] }
 0x4c8   : > { %v1935_v33 = vmul.f32 0.17677669, %v1782_v32  ;;  %v4853_v34 = vpop.f32.mrb[15].mxu1  ;;  %v1944_v36 = vsel %vm1027_vm4, %v1936_v29, -inf  ;;  %v451_v32 = vld [vmem:[%s6074_s3 + $0x48] sm:$0xff] }
 0x4c9   : > { %v452_v34 = vld [vmem:[%s6074_s3 + $0x50] sm:$0xff] }
 0x4ca   : > { %v1941_v35 = vsel %vm1027_vm4, %v1935_v33, -inf }
 0x4cb   : > { %1942 = vmax.xlane.f32.xlu0 %v1941_v35  ;;  %v1930_v37 = vpop.f32.mrb[16].mxu1  ;;  %1945 = vmax.xlane.f32.xlu1 %v1944_v36  ;;  %v453_v35 = vld [vmem:[%s6074_s3 + $0x58] sm:$0xff] }
 0x4cc   : > { %v1937_v38 = vmul.f32 0.17677669, %v1930_v37  ;;  %v4863_v39 = vpop.f32.mrb[17].mxu1  ;;  %v5112_v36 = vpack.c.bf16 %v453_v35, %v452_v34 }
 0x4ce   : > { %v1947_v40 = vsel %vm1027_vm4, %v1937_v38, -inf }
 0x4cf   : > { %1948 = vmax.xlane.f32.xlu0 %v1947_v40 }
 0x554   : > { %v1940_v41 = vpop.xlane.xlu1 %1939 }
 0x555   : > { %v1950_v42 = vsub.f32 %v1934_v25, %v1940_v41 }
 0x557   : > { %v1954_v43 = vmul.f32 1.442695, %v1950_v42 }
 0x558   : > { %v1943_v44 = vpop.xlane.xlu0 %1942  ;;  %v1946_v45 = vpop.xlane.xlu1 %1945 }
 0x559   : > { %5212 = vpow2.f32 %v1954_v43  ;;  %v1951_v46 = vsub.f32 %v1935_v33, %v1943_v44  ;;  %v1952_v47 = vsub.f32 %v1936_v29, %v1946_v45  ;;  %v5100_v29 = vpack.c.bf16 %v421_v22, %v420_v21 }
 0x55a   : > { %v5109_v33 = vpack.c.bf16 %v451_v32, %v450_v31 }
 0x55b   : > { %v1956_v48 = vmul.f32 1.442695, %v1951_v46  ;;  %v1958_v49 = vmul.f32 1.442695, %v1952_v47 }
 0x55c   : > { %v1949_v50 = vpop.xlane.xlu0 %1948 }
 0x55d   : > { %5214 = vpow2.f32 %v1956_v48  ;;  %v1953_v51 = vsub.f32 %v1937_v38, %v1949_v50 }
 0x55e   : > { %5216 = vpow2.f32 %v1958_v49 }
 0x55f   : > { %v1960_v52 = vmul.f32 1.442695, %v1953_v51 }
 0x561   : > { %5218 = vpow2.f32 %v1960_v52 }
 0x563   : > { %v5213_v53 = vpop.eup %5212 }
 0x564   : > { %v1962_v54 = vsel %vm1027_vm4, %v5213_v53, 0.0 }
 0x565   : > { %1963 = vadd.xlane.f32.xlu1 %v1962_v54 }
 0x567   : > { %v5215_v55 = vpop.eup %5214 }
 0x568   : > { %v5217_v56 = vpop.eup %5216  ;;  %v1965_v57 = vsel %vm1027_vm4, %v5215_v55, 0.0 }
 0x569   : > { %1966 = vadd.xlane.f32.xlu0 %v1965_v57  ;;  %v1968_v58 = vsel %vm1027_vm4, %v5217_v56, 0.0 }
 0x56a   : > { %1969 = vadd.xlane.f32.xlu1 %v1968_v58 }
 0x56b   : > { %v5219_v59 = vpop.eup %5218 }
 0x56c   : > { %v1971_v60 = vsel %vm1027_vm4, %v5219_v59, 0.0 }
 0x56d   : > { %1972 = vadd.xlane.f32.xlu0 %v1971_v60 }
 0x5f2   : > { %v1964_v61 = vpop.xlane.xlu1 %1963 }
 0x5f3   : > { %5220 = vrcp.f32 %v1964_v61 }
 0x5f6   : > { %v1967_v62 = vpop.xlane.xlu0 %1966 }
 0x5f7   : > { %5222 = vrcp.f32 %v1967_v62  ;;  %v1970_v63 = vpop.xlane.xlu1 %1969 }
 0x5f8   : > { %5224 = vrcp.f32 %v1970_v63 }
 0x5fa   : > { %v1973_v2 = vpop.xlane.xlu0 %1972 }
 0x5fb   : > { %5226 = vrcp.f32 %v1973_v2 }
 0x5fd   : > { %v5221_v5 = vpop.eup %5220 }
 0x5fe   : > { %v1975_v6 = vmul.f32 %v5221_v5, %v5213_v53 }
 0x600   : > { %4867 = vmatmul.mubr.msk.f32.vlgmr.msra.gmra.mrb[18].mxu0 %vm1072_vm5, %v1975_v6 }
 0x601   : > { %v5223_v12 = vpop.eup %5222  ;;  %4875 = vmatpush3.msk.msra.mxu0 %vm1076_vm3, %v1635_v8  ;;  %4876 = vmatprep.mubr.msk.f32.mxu0 %vm5330_vm0, %v5331_v11 }
 0x602   : > { %v5225_v13 = vpop.eup %5224  ;;  %v1977_v14 = vmul.f32 %v5223_v12, %v5215_v55  ;;  %5096 = vmatprep.subr.bf16.mxu0 %v5329_v3 }
 0x603   : > { %v1979_v19 = vmul.f32 %v5225_v13, %v5217_v56 }
 0x604   : > { %4872 = vmatmul.mubr.msk.f32.vlgmr.msra.gmra.mrb[18].mxu1 %vm1072_vm5, %v1977_v14 }
 0x605   : > { %v5227_v23 = vpop.eup %5226  ;;  %4877 = vmatmul.mubr.msk.f32.vlgmr.msra.gmra.mrb[20].mxu0 %vm1072_vm5, %v1979_v19  ;;  %4880 = vmatpush3.msk.msra.mxu1 %vm1076_vm3, %v1637_v18 }
 0x606   : > { %v1981_v25 = vmul.f32 %v5227_v23, %v5219_v59  ;;  %4881 = vmatprep.mubr.msk.f32.mxu1 %vm5330_vm0, %v5331_v11  ;;  %5102 = vmatprep.subr.bf16.mxu1 %v5329_v3 }
 0x607   : > { %5098 = vmatpush3.bf16.msra.mxu0 %v5097_v20  ;;  %4892 = vmatprep.mubr.msk.f32.mxu0 %vm5330_vm0, %v5331_v11 }
 0x608   : > { %4882 = vmatmul.mubr.msk.f32.vlgmr.msra.gmra.mrb[20].mxu1 %vm1072_vm5, %v1981_v25  ;;  %5099 = vmatprep.subr.bf16.mxu0 %v5329_v3 }
 0x609   : > { %5104 = vmatpush3.bf16.msra.mxu1 %v5103_v24  ;;  %4903 = vmatprep.mubr.msk.f32.mxu1 %vm5330_vm0, %v5331_v11 }
 0x60a   : > { %5105 = vmatprep.subr.bf16.mxu1 %v5329_v3 }
 0x60b   : > { %5101 = vmatpush3.bf16.msra.mxu0 %v5100_v29 }
 0x60c   : > { %5108 = vmatprep.subr.bf16.mxu0 %v5329_v3 }
 0x60d   : > { %5107 = vmatpush3.bf16.msra.mxu1 %v5106_v30 }
 0x60e   : > { %4893 = vmatmul.mubr.msk.f32.vlgmr.msra.gmra.mrb[22].mxu0 %vm458_vm1, %v5496_v16  ;;  %4917 = vmatprep.subr.mxu1 %v5331_v11 }
 0x60f   : > { %4914 = vmatprep.mubr.msk.f32.mxu0 %vm5330_vm0, %v5331_v11  ;;  %5110 = vmatpush3.bf16.msra.mxu0 %v5109_v33 }
 0x610   : > { %4904 = vmatmul.mubr.msk.f32.vlgmr.msra.gmra.mrb[22].mxu1 %vm458_vm1, %v5496_v16  ;;  %5111 = vmatprep.subr.bf16.mxu0 %v5329_v3 }
 0x611   : > { %4919 = vmatprep.mubr.msk.f32.mxu1 %vm5330_vm0, %v5331_v11 }
 0x613   : > { %5113 = vmatpush3.bf16.msra.mxu0 %v5112_v36 }
 0x614   : > { %4927 = vmatprep.subr.mxu0 %v5331_v11 }
 0x616   : > { %4915 = vmatmul.mubr.msk.f32.vlgmr.msra.gmra.mrb[24].mxu0 %vm458_vm1, %v5496_v16 }
 0x617   : > { %4929 = vmatprep.mubr.msk.f32.mxu0 %vm5330_vm0, %v5331_v11 }
 0x6d3   : > { %v2053_v37 = vpop.f32.mrb[18].mxu0 }
 0x6d4   : > { %v4868_v38 = vpop.f32.mrb[19].mxu0 }
 0x6d7   : > { %v2128_v39 = vpop.f32.mrb[18].mxu1 }
 0x6d8   : > { %v4124_v40 = vcombine.low %v2053_v37, %v2128_v39  ;;  %v2203_v41 = vpop.f32.mrb[20].mxu0  ;;  %v4873_v42 = vpop.f32.mrb[19].mxu1 }
 0x6d9   : > { %v4878_v43 = vpop.f32.mrb[21].mxu0 }
 0x6da   : > { %v5757_v47 = vrot.slane %v4124_v40, %v5520_v26 }
 0x6db   : > { %v2278_v44 = vpop.f32.mrb[20].mxu1 }
 0x6dc   : > { %v4125_v45 = vcombine.low %v2203_v41, %v2278_v44  ;;  %v4883_v46 = vpop.f32.mrb[21].mxu1 }
 0x6de   : > { %v5760_v48 = vrot.slane %v4125_v45, %v5520_v26 }
 0x6e0   : > { %v4140_v49 = vcombine.low %v5757_v47, %v5760_v48 }
 0x6e1   : > { %v2348_v50 = vpop.f32.mrb[22].mxu0 }
 0x6e2   : > { %v4894_v51 = vpop.f32.mrb[23].mxu0  ;;  %v2493_v53 = vcombine.high %v2348_v50, %v2348_v50  ;;  %v2500_v57 = vrot.slane %v2348_v50, %v5520_v26 }
 0x6e3   : > { %v2418_v52 = vpop.f32.mrb[22].mxu1 }
 0x6e4   : > { %v2511_v54 = vcombine.high %v2418_v52, %v2418_v52  ;;  %v2518_v55 = vrot.slane %v2418_v52, %v5520_v26  ;;  %v4905_v56 = vpop.f32.mrb[23].mxu1  ;;  %v2507_v59 = vrot.slane %v2493_v53, %v5520_v26  ;;  %v2508_v61 = vcombine.high %v2500_v57, %v2500_v57 }
 0x6e6   : > { %v2525_v58 = vrot.slane %v2511_v54, %v5520_v26  ;;  %4918 = vmatpush3.xpose.msk.msra.mxu1 %vm726_vm2, %v2518_v55  ;;  %v2526_v60 = vcombine.high %v2518_v55, %v2518_v55  ;;  %v2509_v63 = vcombine.high %v2507_v59, %v2507_v59 }
 0x6e7   : > { %4922 = vmatprep.subr.mxu1 %v5331_v11 }
 0x6e8   : > { %4928 = vmatpush3.xpose.msk.msra.mxu0 %vm726_vm2, %v2525_v58  ;;  %v2527_v62 = vcombine.high %v2525_v58, %v2525_v58  ;;  %v422_v58 = vld [vmem:[%s6089_s1 + $0x60] sm:$0xff] }
 0x6e9   : > { %4920 = vmatmul.mubr.msk.f32.vlgmr.msra.gmra.mrb[24].mxu1 %vm726_vm2, %v2500_v57  ;;  %4937 = vmatprep.subr.mxu0 %v5331_v11  ;;  %v5788_v2 = vpop.f32.mrb[24].mxu0 }
 0x6ea   : > { %4923 = vmatpush3.xpose.msk.msra.mxu1 %vm726_vm2, %v2526_v60  ;;  %4924 = vmatprep.mubr.msk.f32.mxu1 %vm5330_vm0, %v5331_v11  ;;  %v2536_v4 = vrot.slane %v5788_v2, %v5520_v26  ;;  %v4916_v5 = vpop.f32.mrb[25].mxu0  ;;  %v2529_v54 = vcombine.high %v5788_v2, %v5788_v2  ;;  %v439_v2 = vld [vmem:[%s6073_s2 + $0x68] sm:$0xff] }
 0x6eb   : > { %4930 = vmatmul.mubr.msk.f32.vlgmr.msra.gmra.mrb[26].mxu0 %vm726_vm2, %v2507_v59  ;;  %4932 = vmatprep.subr.mxu1 %v5331_v11  ;;  %v423_v59 = vld [vmem:[%s6089_s1 + $0x68] sm:$0xff] }
 0x6ec   : > { %4939 = vmatprep.mubr.msk.f32.mxu0 %vm5330_vm0, %v5331_v11  ;;  %v2544_v6 = vcombine.high %v2536_v4, %v2536_v4  ;;  %4938 = vmatpush3.msk.msra.mxu0 %vm1076_vm3, %v2536_v4  ;;  %v2543_v57 = vrot.slane %v2529_v54, %v5520_v26 }
 0x6ed   : > { %4925 = vmatmul.mubr.msk.f32.vlgmr.msra.gmra.mrb[26].mxu1 %vm726_vm2, %v2508_v61  ;;  %4947 = vmatprep.subr.mxu0 %v5331_v11 }
 0x6ee   : > { %4933 = vmatpush3.xpose.msk.msra.mxu1 %vm726_vm2, %v2527_v62  ;;  %4934 = vmatprep.mubr.msk.f32.mxu1 %vm5330_vm0, %v5331_v11  ;;  %v2545_v4 = vcombine.high %v2543_v57, %v2543_v57 }
 0x6ef   : > { %4942 = vmatprep.subr.mxu1 %v5331_v11 }
 0x6f1   : > { %4935 = vmatmul.mubr.msk.f32.vlgmr.msra.gmra.mrb[28].mxu1 %vm726_vm2, %v2509_v63  ;;  %v438_v63 = vld [vmem:[%s6073_s2 + $0x60] sm:$0xff] }
 0x6f2   : > { %4944 = vmatprep.mubr.msk.f32.mxu1 %vm5330_vm0, %v5331_v11  ;;  %4943 = vmatpush3.msk.msra.mxu1 %vm1076_vm3, %v2544_v6  ;;  %v5115_v6 = vpack.c.bf16 %v423_v59, %v422_v58 }
 0x6f3   : > { %4952 = vmatprep.subr.mxu1 %v5331_v11 }
 0x7bc   : > { %v2616_v8 = vpop.f32.mrb[24].mxu1 }
 0x7bd   : > { %v2842_v9 = vmul.f32 0.17677669, %v2616_v8  ;;  %v4921_v10 = vpop.f32.mrb[25].mxu1  ;;  %v424_v8 = vld [vmem:[%s6089_s1 + $0x70] sm:$0xff] }
 0x7be   : > { %v2764_v12 = vpop.f32.mrb[26].mxu0 }
 0x7bf   : > { %v2844_v13 = vmul.f32 0.17677669, %v2764_v12  ;;  %v4931_v14 = vpop.f32.mrb[27].mxu0  ;;  %v2846_v15 = vsel %vm1027_vm4, %v2842_v9, -inf  ;;  %v5121_v12 = vpack.c.bf16 %v439_v2, %v438_v63 }
 0x7c0   : > { %2847 = vmax.xlane.f32.xlu1 %v2846_v15  ;;  %v2690_v17 = vpop.f32.mrb[26].mxu1  ;;  %v440_v14 = vld [vmem:[%s6073_s2 + $0x70] sm:$0xff]  ;;  %v441_v15 = vld [vmem:[%s6073_s2 + $0x78] sm:$0xff] }
 0x7c1   : > { %v2843_v18 = vmul.f32 0.17677669, %v2690_v17  ;;  %v4926_v19 = vpop.f32.mrb[27].mxu1  ;;  %v2852_v21 = vsel %vm1027_vm4, %v2844_v13, -inf }
 0x7c2   : > { %v454_v19 = vld [vmem:[%s6074_s3 + $0x60] sm:$0xff] }
 0x7c3   : > { %v2849_v20 = vsel %vm1027_vm4, %v2843_v18, -inf }
 0x7c4   : > { %2850 = vmax.xlane.f32.xlu0 %v2849_v20  ;;  %v2838_v22 = vpop.f32.mrb[28].mxu1  ;;  %2853 = vmax.xlane.f32.xlu1 %v2852_v21  ;;  %v455_v20 = vld [vmem:[%s6074_s3 + $0x68] sm:$0xff] }
 0x7c5   : > { %v2845_v23 = vmul.f32 0.17677669, %v2838_v22  ;;  %v4936_v24 = vpop.f32.mrb[29].mxu1  ;;  %v5127_v21 = vpack.c.bf16 %v455_v20, %v454_v19  ;;  %v456_v22 = vld [vmem:[%s6074_s3 + $0x70] sm:$0xff] }
 0x7c6   : > { %v5874_v24 = vld [vmem:[%s5493_s19] sm:$0xff]  ;;  %s5333_s19 = smov 16  }
 0x7c7   : > { %v2855_v25 = vsel %vm1027_vm4, %v2845_v23, -inf }
 0x7c8   : > { %2856 = vmax.xlane.f32.xlu0 %v2855_v25 }
 0x84d   : > { %v2848_v27 = vpop.xlane.xlu1 %2847 }
 0x84e   : > { %v2858_v28 = vsub.f32 %v2842_v9, %v2848_v27  ;;  %v425_v9 = vld [vmem:[%s6089_s1 + $0x78] sm:$0xff] }
 0x84f   : > { %v5118_v17 = vpack.c.bf16 %v425_v9, %v424_v8 }
 0x850   : > { %v2862_v29 = vmul.f32 1.442695, %v2858_v28 }
 0x851   : > { %v2851_v30 = vpop.xlane.xlu0 %2850  ;;  %v2854_v31 = vpop.xlane.xlu1 %2853 }
 0x852   : > { %5228 = vpow2.f32 %v2862_v29  ;;  %v2859_v32 = vsub.f32 %v2843_v18, %v2851_v30  ;;  %v2860_v33 = vsub.f32 %v2844_v13, %v2854_v31  ;;  %v5124_v18 = vpack.c.bf16 %v441_v15, %v440_v14 }
 0x854   : > { %v2864_v34 = vmul.f32 1.442695, %v2859_v32  ;;  %v2866_v35 = vmul.f32 1.442695, %v2860_v33 }
 0x855   : > { %v2857_v36 = vpop.xlane.xlu0 %2856 }
 0x856   : > { %5230 = vpow2.f32 %v2864_v34  ;;  %v2861_v37 = vsub.f32 %v2845_v23, %v2857_v36 }
 0x857   : > { %5232 = vpow2.f32 %v2866_v35 }
 0x858   : > { %v2868_v38 = vmul.f32 1.442695, %v2861_v37 }
 0x85a   : > { %5234 = vpow2.f32 %v2868_v38 }
 0x85c   : > { %v5229_v39 = vpop.eup %5228 }
 0x85d   : > { %v2870_v40 = vsel %vm1027_vm4, %v5229_v39, 0.0 }
 0x85e   : > { %2871 = vadd.xlane.f32.xlu1 %v2870_v40 }
 0x860   : > { %v5231_v41 = vpop.eup %5230 }
 0x861   : > { %v5233_v42 = vpop.eup %5232  ;;  %v2873_v43 = vsel %vm1027_vm4, %v5231_v41, 0.0 }
 0x862   : > { %2874 = vadd.xlane.f32.xlu0 %v2873_v43  ;;  %v2876_v44 = vsel %vm1027_vm4, %v5233_v42, 0.0 }
 0x863   : > { %2877 = vadd.xlane.f32.xlu1 %v2876_v44 }
 0x864   : > { %v5235_v45 = vpop.eup %5234 }
 0x865   : > { %v2879_v46 = vsel %vm1027_vm4, %v5235_v45, 0.0 }
 0x866   : > { %2880 = vadd.xlane.f32.xlu0 %v2879_v46 }
 0x8eb   : > { %v2872_v50 = vpop.xlane.xlu1 %2871 }
 0x8ec   : > { %5236 = vrcp.f32 %v2872_v50 }
 0x8ef   : > { %v2875_v51 = vpop.xlane.xlu0 %2874 }
 0x8f0   : > { %5238 = vrcp.f32 %v2875_v51  ;;  %v2878_v52 = vpop.xlane.xlu1 %2877 }
 0x8f1   : > { %5240 = vrcp.f32 %v2878_v52 }
 0x8f3   : > { %v2881_v53 = vpop.xlane.xlu0 %2880 }
 0x8f4   : > { %5242 = vrcp.f32 %v2881_v53 }
 0x8f6   : > { %v5237_v55 = vpop.eup %5236 }
 0x8f7   : > { %v2883_v56 = vmul.f32 %v5237_v55, %v5229_v39 }
 0x8f9   : > { %4940 = vmatmul.mubr.msk.f32.vlgmr.msra.gmra.mrb[28].mxu0 %vm1072_vm5, %v2883_v56 }
 0x8fa   : > { %v5239_v60 = vpop.eup %5238  ;;  %4948 = vmatpush3.msk.msra.mxu0 %vm1076_vm3, %v2543_v57  ;;  %4949 = vmatprep.mubr.msk.f32.mxu0 %vm5330_vm0, %v5331_v11 }
 0x8fb   : > { %v5241_v61 = vpop.eup %5240  ;;  %v2885_v62 = vmul.f32 %v5239_v60, %v5231_v41  ;;  %5114 = vmatprep.subr.bf16.mxu0 %v5329_v3 }
 0x8fc   : > { %v2887_v5 = vmul.f32 %v5241_v61, %v5233_v42 }
 0x8fd   : > { %4945 = vmatmul.mubr.msk.f32.vlgmr.msra.gmra.mrb[30].mxu1 %vm1072_vm5, %v2885_v62 }
 0x8fe   : > { %v5243_v10 = vpop.eup %5242  ;;  %4950 = vmatmul.mubr.msk.f32.vlgmr.msra.gmra.mrb[30].mxu0 %vm1072_vm5, %v2887_v5  ;;  %4953 = vmatpush3.msk.msra.mxu1 %vm1076_vm3, %v2545_v4 }
 0x8ff   : > { %v2889_v13 = vmul.f32 %v5243_v10, %v5235_v45  ;;  %4954 = vmatprep.mubr.msk.f32.mxu1 %vm5330_vm0, %v5331_v11  ;;  %5120 = vmatprep.subr.bf16.mxu1 %v5329_v3 }
 0x900   : > { %5116 = vmatpush3.bf16.msra.mxu0 %v5115_v6  ;;  %4965 = vmatprep.mubr.msk.f32.mxu0 %vm5330_vm0, %v5331_v11 }
 0x901   : > { %4955 = vmatmul.mubr.msk.f32.vlgmr.msra.gmra.mrb[32].mxu1 %vm1072_vm5, %v2889_v13  ;;  %5117 = vmatprep.subr.bf16.mxu0 %v5329_v3 }
 0x902   : > { %5122 = vmatpush3.bf16.msra.mxu1 %v5121_v12  ;;  %4976 = vmatprep.mubr.msk.f32.mxu1 %vm5330_vm0, %v5331_v11 }
 0x903   : > { %5123 = vmatprep.subr.bf16.mxu1 %v5329_v3 }
 0x904   : > { %5119 = vmatpush3.bf16.msra.mxu0 %v5118_v17 }
 0x905   : > { %5126 = vmatprep.subr.bf16.mxu0 %v5329_v3 }
 0x906   : > { %5125 = vmatpush3.bf16.msra.mxu1 %v5124_v18 }
 0x907   : > { %4966 = vmatmul.mubr.msk.f32.vlgmr.msra.gmra.mrb[32].mxu0 %vm458_vm1, %v5496_v16  ;;  %4990 = vmatprep.subr.mxu1 %v5331_v11 }
 0x908   : > { %4987 = vmatprep.mubr.msk.f32.mxu0 %vm5330_vm0, %v5331_v11  ;;  %5128 = vmatpush3.bf16.msra.mxu0 %v5127_v21 }
 0x909   : > { %4977 = vmatmul.mubr.msk.f32.vlgmr.msra.gmra.mrb[34].mxu1 %vm458_vm1, %v5496_v16  ;;  %5129 = vmatprep.subr.bf16.mxu0 %v5329_v3  ;;  %v457_v16 = vld [vmem:[%s6074_s3 + $0x78] sm:$0xff] }
 0x90a   : > { %4992 = vmatprep.mubr.msk.f32.mxu1 %vm5330_vm0, %v5331_v11  ;;  %v5130_v23 = vpack.c.bf16 %v457_v16, %v456_v22 }
 0x90c   : > { %5131 = vmatpush3.bf16.msra.mxu0 %v5130_v23 }
 0x90d   : > { %5000 = vmatprep.subr.mxu0 %v5331_v11 }
 0x90f   : > { %4988 = vmatmul.mubr.msk.f32.vlgmr.msra.gmra.mrb[34].mxu0 %vm458_vm1, %v5874_v24 }
 0x910   : > { %5002 = vmatprep.mubr.msk.f32.mxu0 %vm5330_vm0, %v5331_v11 }
 0x9cc   : > { %v2961_v25 = vpop.f32.mrb[28].mxu0 }
 0x9cd   : > { %v4941_v27 = vpop.f32.mrb[29].mxu0 }
 0x9d0   : > { %v3036_v28 = vpop.f32.mrb[30].mxu1 }
 0x9d1   : > { %v4148_v29 = vcombine.low %v2961_v25, %v3036_v28  ;;  %v3111_v30 = vpop.f32.mrb[30].mxu0  ;;  %v4946_v31 = vpop.f32.mrb[31].mxu1 }
 0x9d2   : > { %v4951_v32 = vpop.f32.mrb[31].mxu0 }
 0x9d3   : > { %v5881_v36 = vrot.slane %v4148_v29, %v5520_v26 }
 0x9d4   : > { %v3186_v33 = vpop.f32.mrb[32].mxu1 }
 0x9d5   : > { %v4149_v34 = vcombine.low %v3111_v30, %v3186_v33  ;;  %v4956_v35 = vpop.f32.mrb[33].mxu1 }
 0x9d7   : > { %v5884_v37 = vrot.slane %v4149_v34, %v5520_v26 }
 0x9d9   : > { %v4164_v38 = vcombine.low %v5881_v36, %v5884_v37 }
 0x9da   : > { %v3256_v39 = vpop.f32.mrb[32].mxu0 }
 0x9db   : > { %v4967_v40 = vpop.f32.mrb[33].mxu0  ;;  %v3401_v42 = vcombine.high %v3256_v39, %v3256_v39  ;;  %v3408_v46 = vrot.slane %v3256_v39, %v5520_v26 }
 0x9dc   : > { %v3326_v41 = vpop.f32.mrb[34].mxu1 }
 0x9dd   : > { %v3419_v43 = vcombine.high %v3326_v41, %v3326_v41  ;;  %v3426_v44 = vrot.slane %v3326_v41, %v5520_v26  ;;  %v4978_v45 = vpop.f32.mrb[35].mxu1  ;;  %v3415_v51 = vrot.slane %v3401_v42, %v5520_v26  ;;  %v3416_v53 = vcombine.high %v3408_v46, %v3408_v46 }
 0x9df   : > { %v3433_v50 = vrot.slane %v3419_v43, %v5520_v26  ;;  %4991 = vmatpush3.xpose.msk.msra.mxu1 %vm726_vm2, %v3426_v44  ;;  %v3434_v52 = vcombine.high %v3426_v44, %v3426_v44  ;;  %v3417_v55 = vcombine.high %v3415_v51, %v3415_v51 }
 0x9e0   : > { %4995 = vmatprep.subr.mxu1 %v5331_v11 }
 0x9e1   : > { %5001 = vmatpush3.xpose.msk.msra.mxu0 %vm726_vm2, %v3433_v50  ;;  %v3435_v54 = vcombine.high %v3433_v50, %v3433_v50 }
 0x9e2   : > { %4993 = vmatmul.mubr.msk.f32.vlgmr.msra.gmra.mrb[36].mxu1 %vm726_vm2, %v3408_v46  ;;  %5010 = vmatprep.subr.mxu0 %v5331_v11  ;;  %v5912_v56 = vpop.f32.mrb[34].mxu0 }
 0x9e3   : > { %4996 = vmatpush3.xpose.msk.msra.mxu1 %vm726_vm2, %v3434_v52  ;;  %4997 = vmatprep.mubr.msk.f32.mxu1 %vm5330_vm0, %v5331_v11  ;;  %v3444_v57 = vrot.slane %v5912_v56, %v5520_v26  ;;  %v4989_v58 = vpop.f32.mrb[35].mxu0  ;;  %v3437_v46 = vcombine.high %v5912_v56, %v5912_v56 }
 0x9e4   : > { %5003 = vmatmul.mubr.msk.f32.vlgmr.msra.gmra.mrb[36].mxu0 %vm726_vm2, %v3415_v51  ;;  %5005 = vmatprep.subr.mxu1 %v5331_v11 }
 0x9e5   : > { %5012 = vmatprep.mubr.msk.f32.mxu0 %vm5330_vm0, %v5331_v11  ;;  %v3452_v59 = vcombine.high %v3444_v57, %v3444_v57  ;;  %5011 = vmatpush3.msk.msra.mxu0 %vm1076_vm3, %v3444_v57  ;;  %v3451_v36 = vrot.slane %v3437_v46, %v5520_v26  ;;  %v4590_v46 = vld [vmem:[%s6078_s7] ss:$0 sm:$0xff] }
 0x9e6   : > { %4998 = vmatmul.mubr.msk.f32.vlgmr.msra.gmra.mrb[38].mxu1 %vm726_vm2, %v3416_v53  ;;  %5020 = vmatprep.subr.mxu0 %v5331_v11 }
 0x9e7   : > { %5006 = vmatpush3.xpose.msk.msra.mxu1 %vm726_vm2, %v3435_v54  ;;  %5007 = vmatprep.mubr.msk.f32.mxu1 %vm5330_vm0, %v5331_v11 }
 0x9e8   : > { %5015 = vmatprep.subr.mxu1 %v5331_v11 }
 0x9ea   : > { %5008 = vmatmul.mubr.msk.f32.vlgmr.msra.gmra.mrb[40].mxu1 %vm726_vm2, %v3417_v55 }
 0x9eb   : > { %5017 = vmatprep.mubr.msk.f32.mxu1 %vm5330_vm0, %v5331_v11  ;;  %5016 = vmatpush3.msk.msra.mxu1 %vm1076_vm3, %v3452_v59 }
 0x9ec   : > { %5025 = vmatprep.subr.mxu1 %v5331_v11 }
 0xab5   : > { %v3524_v60 = vpop.f32.mrb[36].mxu1 }
 0xab6   : > { %v3750_v61 = vmul.f32 0.17677669, %v3524_v60  ;;  %v4994_v62 = vpop.f32.mrb[37].mxu1 }
 0xab7   : > { %v3672_v63 = vpop.f32.mrb[36].mxu0 }
 0xab8   : > { %v3752_v2 = vmul.f32 0.17677669, %v3672_v63  ;;  %v5004_v4 = vpop.f32.mrb[37].mxu0  ;;  %v3754_v5 = vsel %vm1027_vm4, %v3750_v61, -inf }
 0xab9   : > { %3755 = vmax.xlane.f32.xlu0 %v3754_v5  ;;  %v3598_v6 = vpop.f32.mrb[38].mxu1 }
 0xaba   : > { %v3751_v8 = vmul.f32 0.17677669, %v3598_v6  ;;  %v4999_v9 = vpop.f32.mrb[39].mxu1  ;;  %v3760_v12 = vsel %vm1027_vm4, %v3752_v2, -inf }
 0xabc   : > { %v3757_v10 = vsel %vm1027_vm4, %v3751_v8, -inf }
 0xabd   : > { %3758 = vmax.xlane.f32.xlu1 %v3757_v10  ;;  %v3746_v13 = vpop.f32.mrb[40].mxu1  ;;  %3761 = vmax.xlane.f32.xlu0 %v3760_v12 }
 0xabe   : > { %v3753_v14 = vmul.f32 0.17677669, %v3746_v13  ;;  %v5009_v15 = vpop.f32.mrb[41].mxu1 }
 0xac0   : > { %v3763_v17 = vsel %vm1027_vm4, %v3753_v14, -inf }
 0xac1   : > { %3764 = vmax.xlane.f32.xlu1 %v3763_v17 }
 0xb46   : > { %v3756_v18 = vpop.xlane.xlu0 %3755 }
 0xb47   : > { %v3766_v19 = vsub.f32 %v3750_v61, %v3756_v18 }
 0xb49   : > { %v3770_v20 = vmul.f32 1.442695, %v3766_v19 }
 0xb4a   : > { %v3759_v21 = vpop.xlane.xlu1 %3758  ;;  %v3762_v22 = vpop.xlane.xlu0 %3761 }
 0xb4b   : > { %5244 = vpow2.f32 %v3770_v20  ;;  %v3767_v16 = vsub.f32 %v3751_v8, %v3759_v21  ;;  %v3768_v23 = vsub.f32 %v3752_v2, %v3762_v22  ;;  %v4231_v20 = vld [vmem:[%s6077_s6 + $0x18] sm:$0xff]  ;;  %v4233_v22 = vld [vmem:[%s6079_s8] sm:$0xff] }
 0xb4d   : > { %v3772_v25 = vmul.f32 1.442695, %v3767_v16  ;;  %v3774_v27 = vmul.f32 1.442695, %v3768_v23  ;;  %v4234_v16 = vld [vmem:[%s6079_s8 + $0x8] sm:$0xff]  ;;  %v4235_v23 = vld [vmem:[%s6079_s8 + $0x10] sm:$0xff] }
 0xb4e   : > { %v3765_v28 = vpop.xlane.xlu1 %3764 }
 0xb4f   : > { %5246 = vpow2.f32 %v3772_v25  ;;  %v3769_v29 = vsub.f32 %v3753_v14, %v3765_v28  ;;  %v5139_v25 = vpack.c.bf16 %v4234_v16, %v4233_v22 }
 0xb50   : > { %5248 = vpow2.f32 %v3774_v27  ;;  %v4236_v27 = vld [vmem:[%s6079_s8 + $0x18] sm:$0xff] }
 0xb51   : > { %v3776_v30 = vmul.f32 1.442695, %v3769_v29  ;;  %v5142_v28 = vpack.c.bf16 %v4236_v27, %v4235_v23  ;;  %v4237_v29 = vld [vmem:[%s6079_s8 + $0x20] sm:$0xff] }
 0xb53   : > { %5250 = vpow2.f32 %v3776_v30  ;;  %v4238_v30 = vld [vmem:[%s6079_s8 + $0x28] sm:$0xff] }
 0xb55   : > { %v5245_v31 = vpop.eup %5244 }
 0xb56   : > { %v3778_v32 = vsel %vm1027_vm4, %v5245_v31, 0.0 }
 0xb57   : > { %3779 = vadd.xlane.f32.xlu0 %v3778_v32 }
 0xb59   : > { %v5247_v33 = vpop.eup %5246 }
 0xb5a   : > { %v5249_v34 = vpop.eup %5248  ;;  %v3781_v35 = vsel %vm1027_vm4, %v5247_v33, 0.0 }
 0xb5b   : > { %3782 = vadd.xlane.f32.xlu1 %v3781_v35  ;;  %v3784_v39 = vsel %vm1027_vm4, %v5249_v34, 0.0 }
 0xb5c   : > { %3785 = vadd.xlane.f32.xlu0 %v3784_v39  ;;  %v4588_v39 = vld [vmem:[%s6075_s4] ss:$0 sm:$0xff] }
 0xb5d   : > { %v5251_v40 = vpop.eup %5250 }
 0xb5e   : > { %v3787_v41 = vsel %vm1027_vm4, %v5251_v40, 0.0 }
 0xb5f   : > { %3788 = vadd.xlane.f32.xlu1 %v3787_v41  ;;  %v4589_v41 = vld [vmem:[%s6076_s5] ss:$0 sm:$0xff] }
 0xb70   : > { %4165 = vrot.lane.b32.xlu1 %v4164_v38, %s5333_s19 }
 0xb72   : > { %4141 = vrot.lane.b32.xlu0 %v4140_v49, %s5334_s28  ;;  %v3453_v49 = vcombine.high %v3451_v36, %v3451_v36  ;;  %s4597_s28 = sshll.u32 %s5423_s25, 7  ;;  %s5336_s25 = smov [#allocation2]  }
 0xb73   : > { %s6028_s1 = scalar_lea.hbm %s6083_s12, %s4597_s28 }
 0xbe4   : > { %v3780_v42 = vpop.xlane.xlu0 %3779 }
 0xbe5   : > { %5252 = vrcp.f32 %v3780_v42 }
 0xbe8   : > { %v3783_v43 = vpop.xlane.xlu1 %3782 }
 0xbe9   : > { %5254 = vrcp.f32 %v3783_v43  ;;  %v3786_v44 = vpop.xlane.xlu0 %3785 }
 0xbea   : > { %5256 = vrcp.f32 %v3786_v44  ;;  %v4240_v44 = vld [vmem:[%s6079_s8 + $0x38] sm:$0xff] }
 0xbec   : > { %v3789_v45 = vpop.xlane.xlu1 %3788 }
 0xbed   : > { %5258 = vrcp.f32 %v3789_v45  ;;  %v4142_v6 = vpop.permute.xlu0 %4141 }
 0xbef   : > { %v5253_v50 = vpop.eup %5252 }
 0xbf0   : > { %v3791_v51 = vmul.f32 %v5253_v50, %v5245_v31  ;;  %v4166_v8 = vpop.permute.xlu1 %4165  ;;  %v5145_v31 = vpack.c.bf16 %v4238_v30, %v4237_v29 }
 0xbf2   : > { %5013 = vmatmul.mubr.msk.f32.vlgmr.msra.gmra.mrb[38].mxu0 %vm1072_vm5, %v3791_v51 }
 0xbf3   : > { %v5255_v37 = vpop.eup %5254  ;;  %5021 = vmatpush3.msk.msra.mxu0 %vm1076_vm3, %v3451_v36  ;;  %5022 = vmatprep.mubr.msk.f32.mxu0 %vm5330_vm0, %v5331_v11 }
 0xbf4   : > { %v5257_v47 = vpop.eup %5256  ;;  %v3793_v48 = vmul.f32 %v5255_v37, %v5247_v33  ;;  %5132 = vmatprep.subr.bf16.mxu0 %v5329_v3 }
 0xbf5   : > { %v3795_v38 = vmul.f32 %v5257_v47, %v5249_v34  ;;  %v4592_v47 = vld [vmem:[%s6080_s9] ss:$0 sm:$0xff] }
 0xbf6   : > { %5018 = vmatmul.mubr.msk.f32.vlgmr.msra.gmra.mrb[42].mxu1 %vm1072_vm5, %v3793_v48 }
 0xbf7   : > { %v5259_v52 = vpop.eup %5258  ;;  %5023 = vmatmul.mubr.msk.f32.vlgmr.msra.gmra.mrb[40].mxu0 %vm1072_vm5, %v3795_v38  ;;  %5026 = vmatpush3.msk.msra.mxu1 %vm1076_vm3, %v3453_v49 }
 0xbf8   : > { %v3797_v53 = vmul.f32 %v5259_v52, %v5251_v40  ;;  %5027 = vmatprep.mubr.msk.f32.mxu1 %vm5330_vm0, %v5331_v11  ;;  %5038 = vmatprep.mubr.msk.f32.mxu0 %vm5330_vm0, %v5331_v11 }
 0xbf9   : > { %5138 = vmatprep.subr.bf16.mxu1 %v5329_v3 }
 0xbfa   : > { %5028 = vmatmul.mubr.msk.f32.vlgmr.msra.gmra.mrb[44].mxu1 %vm1072_vm5, %v3797_v53 }
 0xbfb   : > { %5057 = vmatprep.mubr.msk.f32.mxu1 %vm5330_vm0, %v5331_v11  ;;  %v4192_v11 = vsel %vm726_vm2, %v4118_v7, %v4142_v6  ;;  %v5133_v7 = vpack.c.bf16 %v4229_v1, %v4228_v0  ;;  %5140 = vmatpush3.bf16.msra.mxu1 %v5139_v25 }
 0xbfc   : > { %v4194_v9 = vsel %vm4193_vm6, %v4192_v11, %v4166_v8  ;;  %5141 = vmatprep.subr.bf16.mxu1 %v5329_v3 }
 0xbfd   : > { %5134 = vmatpush3.bf16.msra.mxu0 %v5133_v7 }
 0xbfe   : > { %5135 = vmatprep.subr.bf16.mxu0 %v5329_v3 }
 0xbff   : > { %5143 = vmatpush3.bf16.msra.mxu1 %v5142_v28 }
 0xc00   : > { %5144 = vmatprep.subr.bf16.mxu1 %v5329_v3 }
 0xc03   : > { %5146 = vmatpush3.bf16.msra.mxu1 %v5145_v31 }
 0xc04   : > { %5147 = vmatprep.subr.bf16.mxu1 %v5329_v3  ;;  %v4239_v3 = vld [vmem:[%s6079_s8 + $0x30] sm:$0xff] }
 0xc05   : > { %v5148_v45 = vpack.c.bf16 %v4240_v44, %v4239_v3 }
 0xc07   : > { %5149 = vmatpush3.bf16.msra.mxu1 %v5148_v45 }
 0xcc5   : > { %v3869_v54 = vpop.f32.mrb[38].mxu0 }
 0xcc6   : > { %v5014_v55 = vpop.f32.mrb[39].mxu0 }
 0xcc9   : > { %v3944_v56 = vpop.f32.mrb[42].mxu1 }
 0xcca   : > { %v4172_v57 = vcombine.low %v3869_v54, %v3944_v56  ;;  %v4019_v58 = vpop.f32.mrb[40].mxu0  ;;  %v5019_v59 = vpop.f32.mrb[43].mxu1 }
 0xccb   : > { %v5024_v60 = vpop.f32.mrb[41].mxu0 }
 0xccc   : > { %v4180_v2 = vrot.slane %v4172_v57, %v5520_v26 }
 0xccd   : > { %v4094_v61 = vpop.f32.mrb[44].mxu1 }
 0xcce   : > { %v4173_v62 = vcombine.low %v4019_v58, %v4094_v61  ;;  %v5029_v63 = vpop.f32.mrb[45].mxu1 }
 0xccf   : > { %v4594_v63 = vld [vmem:[%s6081_s10] ss:$0 sm:$0xff] }
 0xcd0   : > { %v4187_v4 = vrot.slane %v4173_v62, %v5520_v26 }
 0xcd2   : > { %v4188_v5 = vcombine.low %v4180_v2, %v4187_v4  ;;  %v4595_v4 = vld [vmem:[%s6082_s11] ss:$0 sm:$0xff] }
 0xcd4   : > { %4189 = vrot.lane.b32.xlu1 %v4188_v5, %s5335_s15  ;;  %s404_s15 = scalar_lea.vmem [#allocation2], %s4510_s20  ;;  %s5269_s20 = sshll.u32 %s5336_s25, 4  ;;  %s5270_s20 = int_to_ptr.vmem [resolvable:$false] %s5269_s20 }
 0xcd5   : > { %s4447_s16 = sshll.u32 %s404_s15, 4  ;;  %s5271_s29 = scalar_lea.vmem %s5270_s20, 256  ;;  %s6030_s16 = int_to_ptr.vmem [resolvable:$true] %s4447_s16 }
 0xcd6   : > { %s5265_s30 = scalar_lea.vmem %s6030_s16, 128  ;;  %p5272_p0 = scmp.lt.s32.totalorder %s6030_s16, %s5270_s20 }
 0xcd7   : > { %p5266_p11 = scmp.ne.s32.totalorder %s6030_s16, %s5265_s30  ;;  %p5273_p1 = scmp.lt.s32.totalorder %s5271_s29, %s5265_s30 }
 0xcd9   : > { %p5267_p12 = pnand %p5266_p11, %p5440_p5  ;;  %p5274_p2 = por %p5273_p1, %p5272_p0 }
 0xcdb   : > { %p5268_p13 = pneg %p5267_p12 }
 0xcdd   : > { %p5275_p3 = pnand %p5274_p2, %p5268_p13 }
 0xd46   : > { %v4190_v10 = vpop.permute.xlu1 %4189 }
 0xd47   : > { %v4196_v12 = vsel %vm4195_vm7, %v4194_v9, %v4190_v10 }
 0xd48   : > { %v4197_v13 = vadd.f32 %v5874_v24, %v4196_v12  ;;  %v4230_v24 = vld [vmem:[%s6077_s6 + $0x10] sm:$0xff] }
 0xd49   : > { %v5136_v21 = vpack.c.bf16 %v4231_v20, %v4230_v24 }
 0xd4a   : > { %v4200_v14 = vsel %vm458_vm1, %v4197_v13, 0.0 }
 0xd4b   : > { %4201 = vadd.xlane.f32.xlu1 %v4200_v14  ;;  %5137 = vmatpush3.bf16.msra.mxu0 %v5136_v21 }
 0xdd8   : > { %v4202_v26 = vpop.xlane.xlu1 %4201 }
 0xdd9   : > { %v4204_v15 = vmul.f32 0.03125, %v4202_v26 }
 0xddb   : > { %v4205_v17 = vsub.f32 %v4197_v13, %v4204_v15 }
 0xddd   : > { %v4206_v18 = vmul.f32 %v4205_v17, %v4205_v17 }
 0xddf   : > { %v4207_v19 = vsel %vm458_vm1, %v4206_v18, 0.0 }
 0xde0   : > { %4208 = vadd.xlane.f32.xlu0 %v4207_v19 }
 0xe6d   : > { %v4209_v32 = vpop.xlane.xlu0 %4208 }
 0xe6e   : > { %v4210_v33 = vmul.f32 0.03125, %v4209_v32 }
 0xe70   : > { %v4211_v34 = vadd.f32 1e-05, %v4210_v33 }
 0xe72   : > { %5260 = vrsqrt.f32 %v4211_v34 }
 0xe7c   : > { %v5261_v35 = vpop.eup %5260 }
 0xe7d   : > { %v4213_v40 = vmul.f32 %v5261_v35, %v4205_v17 }
 0xe7f   : > { %v4220_v42 = vmul.f32 %v4588_v39, %v4213_v40 }
 0xe81   : > { %v4227_v43 = vadd.f32 %v4589_v41, %v4220_v42 }
 0xe83   : > { %5039 = vmatmul.mubr.msk.f32.vlgmr.msra.gmra.mrb[42].mxu0 %vm458_vm1, %v4227_v43 }
 0xf56   : > { %v4317_v50 = vpop.f32.mrb[42].mxu0 }
 0xf57   : > { %v4318_v51 = vadd.f32 %v4590_v46, %v4317_v50  ;;  %v5040_v36 = vpop.f32.mrb[43].mxu0 }
 0xf59   : > { %v4321_v37 = vmax.f32 %v4318_v51, 0.0 }
 0xf5b   : > { %5058 = vmatmul.mubr.msk.f32.vlgmr.msra.gmra.mrb[46].mxu1 %vm4328_vm8, %v4321_v37 }
0x102e   : > { %v4398_v48 = vpop.f32.mrb[46].mxu1 }
0x102f   : > { %v4399_v49 = vadd.f32 %v4592_v47, %v4398_v48  ;;  %v5059_v38 = vpop.f32.mrb[47].mxu1 }
0x1031   : > { %v4402_v52 = vadd.f32 %v4399_v49, %v4227_v43 }
0x1033   : > { %v4405_v53 = vsel %vm458_vm1, %v4402_v52, 0.0 }
0x1034   : > { %4406 = vadd.xlane.f32.xlu0 %v4405_v53 }
0x10c1   : > { %v4407_v54 = vpop.xlane.xlu0 %4406 }
0x10c2   : > { %v4408_v55 = vmul.f32 0.03125, %v4407_v54 }
0x10c4   : > { %v4409_v56 = vsub.f32 %v4402_v52, %v4408_v55 }
0x10c6   : > { %v4410_v57 = vmul.f32 %v4409_v56, %v4409_v56 }
0x10c8   : > { %v4411_v58 = vsel %vm458_vm1, %v4410_v57, 0.0 }
0x10c9   : > { %4412 = vadd.xlane.f32.xlu0 %v4411_v58 }
0x1156   : > { %v4413_v59 = vpop.xlane.xlu0 %4412 }
0x1157   : > { %v4414_v60 = vmul.f32 0.03125, %v4413_v59 }
0x1159   : > { %v4415_v61 = vadd.f32 1e-05, %v4414_v60 }
0x115b   : > { %5262 = vrsqrt.f32 %v4415_v61 }
0x1165   : > { %v5263_v62 = vpop.eup %5262 }
0x1166   : > { %v4417_v2 = vmul.f32 %v5263_v62, %v4409_v56 }
0x1168   : > { %v4424_v5 = vmul.f32 %v4594_v63, %v4417_v2 }
0x116a   : > { %v4431_v6 = vadd.f32 %v4595_v4, %v4424_v5 }
0x116c   : > { %4432 = vst.msk [vmem:[%s404_s15] sm:$0xff] %vm458_vm1, %v4431_v6 }
0x116d   : > { %5278 = shalt.err (!%p5275_p3)
}
0x116e   : > { %s5279_s0 = scalar_lea.hbm %s6028_s1, 128  ;;  %s5283_s28 = scalar_lea.hbm %s6083_s12, 512 }
0x116f   : > { %p5280_p4 = scmp.ne.s32.totalorder %s6028_s1, %s5279_s0  ;;  %p5284_p9 = scmp.lt.u32.totalorder %s6028_s1, %s6083_s12 }
0x1170   : > { %p5285_p10 = scmp.lt.u32.totalorder %s5283_s28, %s5279_s0  ;;  %p5287_p12 = scmp.lt.u32.totalorder %s5279_s0, %s6028_s1 }
0x1171   : > { %p5281_p7 = pnand %p5280_p4, %p5440_p5 }
0x1172   : > { %p5286_p11 = por %p5285_p10, %p5284_p9 }
0x1173   : > { %p5282_p8 = pneg %p5281_p7 }
0x1174   : > { %p5288_p13 = por %p5287_p12, %p5286_p11 }
0x1176   : > { %p5289_p0 = pnand %p5288_p13, %p5282_p8 }
0x1178   : > { %5292 = shalt.err (!%p5289_p0)
}
0x1179   : > { %5150 = dma.vmem_to_hbm [thread:$0]  (%p5440_p5), %s6030_s16, 128, %s6028_s1, %s4434_s26  }
0x117a PF: > { %p5156_p1 = scmp.ge.s32.totalorder %s5327_s24, 2  ;;  %s4459_s30 = sand.u32 1, %s5315_s21  }
0x117b   : > { %s4460_s25 = scalar_lea.sflag [#allocation3], %s4459_s30 }
0x117c   : > { %p5153_p2 = pnand %p5156_p1, %p5444_p6 }
0x117e   : > { %5310 = dma.done.wait (!%p5153_p2), %s4460_s25, 128  }
0x117f   : > { %5312 = vsyncadd (!%p5153_p2), %s4460_s25, 4294967168  ;;  %s6091_s20 = sld [smem:[#allocation5_spill]]  ;;  %p22_p3 = scmp.ge.s32.totalorder %s5427_s27, 6  }
0x1180   : > { %s6092_s21 = smov %s5319_s22  ;;  %s6093_s22 = smov %s5323_s23 }
0x1181   : > { %s6095_s24 = smov %s5427_s27  ;;  %24 = sbr.rel (!%p22_p3) target bundleno = 6 (0x6), region = 103 }
0x1185   : > { %s6094_s23 = smov %s6091_s20 }
0x1188   :  { %4465 = vsyncpa [#allocation3], 1 }
0x1189   :  { %4467 = vsyncpa [#allocation3 + $0x1], 1 }

</bundles_post_ra>
